<compile_context>
chip_gen: v6e
topology: v6e:2x2x1
jax: 0.10.0
libtpu: 0.0.40
codegen_flags: <defaults>
</compile_context>

<pallas_src>
import functools

import jax
import jax.numpy as jnp
from jax.experimental import pallas as pl
from jax.experimental.pallas import tpu as pltpu

VMEM = pltpu.MemorySpace.VMEM
LOGIT_PAD = 128  # lane-dense logits width (sliced back to 2 outside the kernel)


# ------------------------------ fused kernel -------------------------------- #

def _layernorm(x, g, b, eps):
    mu = jnp.mean(x, axis=-1, keepdims=True)
    xc = x - mu
    var = jnp.mean(xc * xc, axis=-1, keepdims=True)
    return (xc * jax.lax.rsqrt(var + eps)) * g + b


def _gelu(x):
    # TODO(synk): HF BertModel uses exact erf GELU; tanh approximation used here.
    return 0.5 * x * (1.0 + jnp.tanh(0.7978845608028654 * (x + 0.044715 * x * x * x)))


def _bert_fused_kernel(num_layers, num_heads, eps,
                       emb_ref, bias_ref, eg_ref, eb_ref,
                       wqkv_ref, bqkv_ref, wo_ref, bo_ref,
                       g1_ref, b1_ref, w1_ref, bi1_ref,
                       w2_ref, bi2_ref, g2_ref, b2_ref,
                       pw_ref, pb_ref, fw_ref, fb_ref,
                       o_ref):
    S, H = emb_ref.shape[1], emb_ref.shape[2]
    Dh = H // num_heads

    # Embedding LayerNorm (fp32), one batch element per grid step.
    x = _layernorm(emb_ref[0], eg_ref[...], eb_ref[...], eps)          # (S, H)
    bias = bias_ref[0]                                                 # (1, S) key bias

    for l in range(num_layers):
        # ---- fused QKV projection: one MXU matmul, bf16 operands, fp32 acc ----
        xb = x.astype(jnp.bfloat16)
        qkv = jnp.dot(xb, wqkv_ref[l],
                      preferred_element_type=jnp.float32) + bqkv_ref[l]   # (S, 3H)

        # Heads become a dot_general batch dim (no per-head loop, no concat).
        # 1/sqrt(Dh) is already folded into the Q weights/bias.
        q = qkv[:, 0 * H:1 * H].reshape(S, num_heads, Dh).astype(jnp.bfloat16)
        k = qkv[:, 1 * H:2 * H].reshape(S, num_heads, Dh).astype(jnp.bfloat16)
        v = qkv[:, 2 * H:3 * H].reshape(S, num_heads, Dh).astype(jnp.bfloat16)

        s = jnp.einsum('qhd,khd->hqk', q, k,
                       preferred_element_type=jnp.float32)              # (nH, S, S)
        s = s + bias[None, :, :]                                        # broadcast key bias
        m = jnp.max(s, axis=-1, keepdims=True)
        p = jnp.exp(s - m)
        denom = jnp.sum(p, axis=-1, keepdims=True)
        p = p * pl.reciprocal(denom, approx=True)

        ctx = jnp.einsum('hqk,khd->qhd', p.astype(jnp.bfloat16), v,
                         preferred_element_type=jnp.float32).reshape(S, H)

        attn = jnp.dot(ctx.astype(jnp.bfloat16), wo_ref[l],
                       preferred_element_type=jnp.float32) + bo_ref[l]
        x = _layernorm(attn + x, g1_ref[l], b1_ref[l], eps)

        # ---- FFN ----
        hb = x.astype(jnp.bfloat16)
        hdn = jnp.dot(hb, w1_ref[l],
                      preferred_element_type=jnp.float32) + bi1_ref[l]
        hdn = _gelu(hdn)
        ffn = jnp.dot(hdn.astype(jnp.bfloat16), w2_ref[l],
                      preferred_element_type=jnp.float32) + bi2_ref[l]
        x = _layernorm(ffn + x, g2_ref[l], b2_ref[l], eps)

    # ---- pooler + fc2 on the full (S, H) tile (row 0 = [CLS] is the used row) ----
    # S=8 rows / 128 padded lanes -> unmasked sublane+lane-dense store.
    pooled = jnp.tanh(jnp.dot(x.astype(jnp.bfloat16), pw_ref[...],
                              preferred_element_type=jnp.float32) + pb_ref[...])
    logits = jnp.dot(pooled.astype(jnp.bfloat16), fw_ref[...],
                     preferred_element_type=jnp.float32) + fb_ref[...]
    o_ref[0] = logits.astype(o_ref.dtype)


# --------------------------- model config / params -------------------------- #

class Config:
    vocab_size = 50
    hidden = 32
    heads = 2
    layers = 2
    intermediate = 64
    max_pos = 16
    type_vocab = 2


def init_params(key, cfg):
    def nrm(k, shape, scale=0.02):
        return scale * jax.random.normal(k, shape, jnp.float32)

    keys = iter(jax.random.split(key, 64))
    p = {}
    p["word_emb"] = nrm(next(keys), (cfg.vocab_size, cfg.hidden))
    p["pos_emb"] = nrm(next(keys), (cfg.max_pos, cfg.hidden))
    p["tok_emb"] = nrm(next(keys), (cfg.type_vocab, cfg.hidden))
    p["emb_ln_g"] = jnp.ones((cfg.hidden,), jnp.float32)
    p["emb_ln_b"] = jnp.zeros((cfg.hidden,), jnp.float32)
    p["layers"] = []
    for _ in range(cfg.layers):
        lp = {}
        for name in ("wq", "wk", "wv", "wo"):
            lp[name] = nrm(next(keys), (cfg.hidden, cfg.hidden))
            lp[name + "_b"] = jnp.zeros((cfg.hidden,), jnp.float32)
        lp["ln1_g"] = jnp.ones((cfg.hidden,), jnp.float32)
        lp["ln1_b"] = jnp.zeros((cfg.hidden,), jnp.float32)
        lp["w1"] = nrm(next(keys), (cfg.hidden, cfg.intermediate))
        lp["w1_b"] = jnp.zeros((cfg.intermediate,), jnp.float32)
        lp["w2"] = nrm(next(keys), (cfg.intermediate, cfg.hidden))
        lp["w2_b"] = jnp.zeros((cfg.hidden,), jnp.float32)
        lp["ln2_g"] = jnp.ones((cfg.hidden,), jnp.float32)
        lp["ln2_b"] = jnp.zeros((cfg.hidden,), jnp.float32)
        p["layers"].append(lp)
    p["pool_w"] = nrm(next(keys), (cfg.hidden, cfg.hidden))
    p["pool_b"] = jnp.zeros((cfg.hidden,), jnp.float32)
    p["fc2_w"] = nrm(next(keys), (cfg.hidden, 2))
    p["fc2_b"] = jnp.zeros((2,), jnp.float32)
    return p


# --------------------------------- forward ---------------------------------- #

def bert_arch_forward(params, sent_id, mask, cfg):
    B, S = sent_id.shape
    H, nH, L, I = cfg.hidden, cfg.heads, cfg.layers, cfg.intermediate
    Dh = H // nH
    scale = 1.0 / (Dh ** 0.5)

    # Embedding lookups are gathers (glue, plain JAX).
    # TODO(synk): token_type_ids are always segment 0 (matches original usage).
    emb = (params["word_emb"][sent_id]
           + params["pos_emb"][jnp.arange(S)][None, :, :]
           + params["tok_emb"][0][None, None, :]).astype(jnp.float32)      # (B, S, H)

    # Per-batch additive key bias (0 for attended keys, -1e4 for masked keys).
    attn_bias = ((1.0 - mask.astype(jnp.float32)) * -10000.0).reshape(B, 1, S)

    # Stack per-layer weights; matmul operands in bf16.  Attention scale is folded
    # into the Q columns of the fused QKV weight/bias.
    def stk(name):
        return jnp.stack([lp[name] for lp in params["layers"]])

    wqkv = jnp.stack([jnp.concatenate([lp["wq"] * scale, lp["wk"], lp["wv"]], axis=1)
                      for lp in params["layers"]]).astype(jnp.bfloat16)    # (L, H, 3H)
    bqkv = jnp.stack([jnp.concatenate([lp["wq_b"] * scale, lp["wk_b"], lp["wv_b"]])
                      for lp in params["layers"]]).reshape(L, 1, 3 * H)    # (L, 1, 3H) f32
    wo = stk("wo").astype(jnp.bfloat16)
    bo = stk("wo_b").reshape(L, 1, H)
    g1 = stk("ln1_g").reshape(L, 1, H)
    b1 = stk("ln1_b").reshape(L, 1, H)
    w1 = stk("w1").astype(jnp.bfloat16)
    bi1 = stk("w1_b").reshape(L, 1, I)
    w2 = stk("w2").astype(jnp.bfloat16)
    bi2 = stk("w2_b").reshape(L, 1, H)
    g2 = stk("ln2_g").reshape(L, 1, H)
    b2 = stk("ln2_b").reshape(L, 1, H)
    pool_w = params["pool_w"].astype(jnp.bfloat16)
    pool_b = params["pool_b"].reshape(1, H)
    fc2_w = jnp.zeros((H, LOGIT_PAD), jnp.float32).at[:, :2].set(
        params["fc2_w"]).astype(jnp.bfloat16)                              # lane-dense
    fc2_b = jnp.zeros((1, LOGIT_PAD), jnp.float32).at[:, :2].set(params["fc2_b"])

    kernel = functools.partial(_bert_fused_kernel, L, nH, 1e-12)
    logits_pad = pl.pallas_call(
        kernel,
        out_shape=jax.ShapeDtypeStruct((B, S, LOGIT_PAD), jnp.float32),
        grid=(B,),
        in_specs=[
            pl.BlockSpec((1, S, H), lambda b: (b, 0, 0)),      # per-batch activations
            pl.BlockSpec((1, 1, S), lambda b: (b, 0, 0)),      # per-batch key bias
        ] + [pl.BlockSpec(memory_space=VMEM)] * 18,            # weights fully VMEM-resident
        out_specs=pl.BlockSpec((1, S, LOGIT_PAD), lambda b: (b, 0, 0)),
        compiler_params=pltpu.CompilerParams(
            dimension_semantics=("parallel",),                 # shards batch across TCs on v7x
            vmem_limit_bytes=32 * 1024 * 1024),
    )(emb, attn_bias,
      params["emb_ln_g"].reshape(1, H), params["emb_ln_b"].reshape(1, H),
      wqkv, bqkv, wo, bo, g1, b1, w1, bi1, w2, bi2, g2, b2,
      pool_w, pool_b, fc2_w, fc2_b)

    # Row 0 of each batch block is the [CLS] row; first 2 lanes are the real logits.
    return logits_pad[:, 0, :2]


# ----------------------------------- main ----------------------------------- #

if __name__ == "__main__":
    cfg = Config()
    B, S = 2, 8

    key = jax.random.PRNGKey(0)
    k_param, k_ids = jax.random.split(key)
    params = init_params(k_param, cfg)

    sent_id = jax.random.randint(k_ids, (B, S), 0, cfg.vocab_size, dtype=jnp.int32)
    mask = jnp.array([[1, 1, 1, 1, 1, 1, 0, 0],
                      [1, 1, 1, 1, 1, 1, 1, 1]], dtype=jnp.int32)

    fwd = jax.jit(lambda p, ids, m: bert_arch_forward(p, ids, m, cfg))
    logits = jax.block_until_ready(fwd(params, sent_id, mask))
    assert logits.shape == (B, 2) and logits.dtype == jnp.float32
    print("KERNEL_OK")
</pallas_src>

<mosaic_0001>
module attributes {stable_mosaic.version = 11 : i64} {
  func.func @_bert_fused_kernel(%arg0: i32, %arg1: memref<1x8x32xf32, #tpu.memory_space<vmem>>, %arg2: memref<1x1x8xf32, #tpu.memory_space<vmem>>, %arg3: memref<1x32xf32, #tpu.memory_space<vmem>>, %arg4: memref<1x32xf32, #tpu.memory_space<vmem>>, %arg5: memref<2x32x96xbf16, #tpu.memory_space<vmem>>, %arg6: memref<2x1x96xf32, #tpu.memory_space<vmem>>, %arg7: memref<2x32x32xbf16, #tpu.memory_space<vmem>>, %arg8: memref<2x1x32xf32, #tpu.memory_space<vmem>>, %arg9: memref<2x1x32xf32, #tpu.memory_space<vmem>>, %arg10: memref<2x1x32xf32, #tpu.memory_space<vmem>>, %arg11: memref<2x32x64xbf16, #tpu.memory_space<vmem>>, %arg12: memref<2x1x64xf32, #tpu.memory_space<vmem>>, %arg13: memref<2x64x32xbf16, #tpu.memory_space<vmem>>, %arg14: memref<2x1x32xf32, #tpu.memory_space<vmem>>, %arg15: memref<2x1x32xf32, #tpu.memory_space<vmem>>, %arg16: memref<2x1x32xf32, #tpu.memory_space<vmem>>, %arg17: memref<32x32xbf16, #tpu.memory_space<vmem>>, %arg18: memref<1x32xf32, #tpu.memory_space<vmem>>, %arg19: memref<32x128xbf16, #tpu.memory_space<vmem>>, %arg20: memref<1x128xf32, #tpu.memory_space<vmem>>, %arg21: memref<1x8x128xf32, #tpu.memory_space<vmem>>) attributes {dimension_semantics = [#tpu.dimension_semantics<parallel>], iteration_bounds = array<i64: 2>, scalar_prefetch = 0 : i64, scratch_operands = 0 : i64, tpu.core_type = #tpu.core_type<tc>, window_params = [{transform_indices = @transform_0, window_bounds = array<i64: 1, 8, 32>}, {transform_indices = @transform_1, window_bounds = array<i64: 1, 1, 8>}, {pipeline_mode = #tpu.pipeline_mode<synchronous>, transform_indices = @transform_2, window_bounds = array<i64: 1, 32>}, {pipeline_mode = #tpu.pipeline_mode<synchronous>, transform_indices = @transform_3, window_bounds = array<i64: 1, 32>}, {pipeline_mode = #tpu.pipeline_mode<synchronous>, transform_indices = @transform_4, window_bounds = array<i64: 2, 32, 96>}, {pipeline_mode = #tpu.pipeline_mode<synchronous>, transform_indices = @transform_5, window_bounds = array<i64: 2, 1, 96>}, {pipeline_mode = #tpu.pipeline_mode<synchronous>, transform_indices = @transform_6, window_bounds = array<i64: 2, 32, 32>}, {pipeline_mode = #tpu.pipeline_mode<synchronous>, transform_indices = @transform_7, window_bounds = array<i64: 2, 1, 32>}, {pipeline_mode = #tpu.pipeline_mode<synchronous>, transform_indices = @transform_8, window_bounds = array<i64: 2, 1, 32>}, {pipeline_mode = #tpu.pipeline_mode<synchronous>, transform_indices = @transform_9, window_bounds = array<i64: 2, 1, 32>}, {pipeline_mode = #tpu.pipeline_mode<synchronous>, transform_indices = @transform_10, window_bounds = array<i64: 2, 32, 64>}, {pipeline_mode = #tpu.pipeline_mode<synchronous>, transform_indices = @transform_11, window_bounds = array<i64: 2, 1, 64>}, {pipeline_mode = #tpu.pipeline_mode<synchronous>, transform_indices = @transform_12, window_bounds = array<i64: 2, 64, 32>}, {pipeline_mode = #tpu.pipeline_mode<synchronous>, transform_indices = @transform_13, window_bounds = array<i64: 2, 1, 32>}, {pipeline_mode = #tpu.pipeline_mode<synchronous>, transform_indices = @transform_14, window_bounds = array<i64: 2, 1, 32>}, {pipeline_mode = #tpu.pipeline_mode<synchronous>, transform_indices = @transform_15, window_bounds = array<i64: 2, 1, 32>}, {pipeline_mode = #tpu.pipeline_mode<synchronous>, transform_indices = @transform_16, window_bounds = array<i64: 32, 32>}, {pipeline_mode = #tpu.pipeline_mode<synchronous>, transform_indices = @transform_17, window_bounds = array<i64: 1, 32>}, {pipeline_mode = #tpu.pipeline_mode<synchronous>, transform_indices = @transform_18, window_bounds = array<i64: 32, 128>}, {pipeline_mode = #tpu.pipeline_mode<synchronous>, transform_indices = @transform_19, window_bounds = array<i64: 1, 128>}, {transform_indices = @transform_20, window_bounds = array<i64: 1, 8, 128>}]} {
    %c0 = arith.constant 0 : index
    %c0_0 = arith.constant 0 : index
    %c0_1 = arith.constant 0 : index
    %0 = vector.load %arg1[%c0, %c0_0, %c0_1] : memref<1x8x32xf32, #tpu.memory_space<vmem>>, vector<1x8x32xf32>
    %1 = vector.shape_cast %0 : vector<1x8x32xf32> to vector<8x32xf32>
    %c0_2 = arith.constant 0 : index
    %c0_3 = arith.constant 0 : index
    %2 = vector.load %arg3[%c0_2, %c0_3] : memref<1x32xf32, #tpu.memory_space<vmem>>, vector<1x32xf32>
    %c0_4 = arith.constant 0 : index
    %c0_5 = arith.constant 0 : index
    %3 = vector.load %arg4[%c0_4, %c0_5] : memref<1x32xf32, #tpu.memory_space<vmem>>, vector<1x32xf32>
    %cst = arith.constant dense<0.000000e+00> : vector<8xf32>
    %4 = vector.multi_reduction <add>, %1, %cst [1] : vector<8x32xf32> to vector<8xf32>
    %5 = vector.shape_cast %4 : vector<8xf32> to vector<8x1xf32>
    %cst_6 = arith.constant 3.200000e+01 : f32
    %6 = vector.broadcast %cst_6 : f32 to vector<8x1xf32>
    %7 = arith.divf %5, %6 : vector<8x1xf32>
    %8 = vector.broadcast %7 : vector<8x1xf32> to vector<8x32xf32>
    %9 = arith.subf %1, %8 : vector<8x32xf32>
    %10 = arith.mulf %9, %9 : vector<8x32xf32>
    %cst_7 = arith.constant dense<0.000000e+00> : vector<8xf32>
    %11 = vector.multi_reduction <add>, %10, %cst_7 [1] : vector<8x32xf32> to vector<8xf32>
    %12 = vector.shape_cast %11 : vector<8xf32> to vector<8x1xf32>
    %cst_8 = arith.constant 3.200000e+01 : f32
    %13 = vector.broadcast %cst_8 : f32 to vector<8x1xf32>
    %14 = arith.divf %12, %13 : vector<8x1xf32>
    %cst_9 = arith.constant 9.99999996E-13 : f32
    %15 = vector.broadcast %cst_9 : f32 to vector<8x1xf32>
    %16 = arith.addf %14, %15 : vector<8x1xf32>
    %17 = math.rsqrt %16 : vector<8x1xf32>
    %18 = vector.broadcast %17 : vector<8x1xf32> to vector<8x32xf32>
    %19 = arith.mulf %9, %18 : vector<8x32xf32>
    %20 = vector.broadcast %2 : vector<1x32xf32> to vector<8x32xf32>
    %21 = arith.mulf %19, %20 : vector<8x32xf32>
    %22 = vector.broadcast %3 : vector<1x32xf32> to vector<8x32xf32>
    %23 = arith.addf %21, %22 : vector<8x32xf32>
    %c0_10 = arith.constant 0 : index
    %c0_11 = arith.constant 0 : index
    %c0_12 = arith.constant 0 : index
    %24 = vector.load %arg2[%c0_10, %c0_11, %c0_12] : memref<1x1x8xf32, #tpu.memory_space<vmem>>, vector<1x1x8xf32>
    %25 = vector.shape_cast %24 : vector<1x1x8xf32> to vector<1x8xf32>
    %26 = arith.truncf %23 : vector<8x32xf32> to vector<8x32xbf16>
    %c0_13 = arith.constant 0 : index
    %c0_14 = arith.constant 0 : index
    %c0_15 = arith.constant 0 : index
    %27 = vector.load %arg5[%c0_13, %c0_14, %c0_15] : memref<2x32x96xbf16, #tpu.memory_space<vmem>>, vector<1x32x96xbf16>
    %28 = vector.shape_cast %27 : vector<1x32x96xbf16> to vector<32x96xbf16>
    %cst_16 = arith.constant dense<0.000000e+00> : vector<8x96xf32>
    %29 = tpu.matmul %26, %28, %cst_16 {dimension_numbers = #tpu.dot_dimension_numbers<[1], [0], [0], [1], [0, 0, 1, 1], [], []>} : vector<8x32xbf16>, vector<32x96xbf16>, vector<8x96xf32> -> vector<8x96xf32>
    %c0_17 = arith.constant 0 : index
    %c0_18 = arith.constant 0 : index
    %c0_19 = arith.constant 0 : index
    %30 = vector.load %arg6[%c0_17, %c0_18, %c0_19] : memref<2x1x96xf32, #tpu.memory_space<vmem>>, vector<1x1x96xf32>
    %31 = vector.shape_cast %30 : vector<1x1x96xf32> to vector<1x96xf32>
    %32 = vector.broadcast %31 : vector<1x96xf32> to vector<8x96xf32>
    %33 = arith.addf %29, %32 : vector<8x96xf32>
    %34 = vector.extract_strided_slice %33 {offsets = [0, 0], sizes = [8, 32], strides = [1, 1]} : vector<8x96xf32> to vector<8x32xf32>
    %35 = vector.shape_cast %34 : vector<8x32xf32> to vector<8x2x16xf32>
    %36 = arith.truncf %35 : vector<8x2x16xf32> to vector<8x2x16xbf16>
    %37 = vector.extract_strided_slice %33 {offsets = [0, 32], sizes = [8, 32], strides = [1, 1]} : vector<8x96xf32> to vector<8x32xf32>
    %38 = vector.shape_cast %37 : vector<8x32xf32> to vector<8x2x16xf32>
    %39 = arith.truncf %38 : vector<8x2x16xf32> to vector<8x2x16xbf16>
    %40 = vector.extract_strided_slice %33 {offsets = [0, 64], sizes = [8, 32], strides = [1, 1]} : vector<8x96xf32> to vector<8x32xf32>
    %41 = vector.shape_cast %40 : vector<8x32xf32> to vector<8x2x16xf32>
    %42 = arith.truncf %41 : vector<8x2x16xf32> to vector<8x2x16xbf16>
    "tpu.trace_start"() <{level = 10 : i32, message = "qhd,khd->hqk"}> : () -> ()
    %cst_20 = arith.constant dense<0.000000e+00> : vector<2x8x8xf32>
    %43 = tpu.matmul %36, %39, %cst_20 {dimension_numbers = #tpu.dot_dimension_numbers<[2], [2], [0], [0], [0, 1, 0, 0, 1, 0], [1], [1]>} : vector<8x2x16xbf16>, vector<8x2x16xbf16>, vector<2x8x8xf32> -> vector<2x8x8xf32>
    "tpu.trace_stop"() : () -> ()
    %44 = vector.shape_cast %25 : vector<1x8xf32> to vector<1x1x8xf32>
    %45 = vector.broadcast %44 : vector<1x1x8xf32> to vector<2x8x8xf32>
    %46 = arith.addf %43, %45 : vector<2x8x8xf32>
    %cst_21 = arith.constant dense<0xFF800000> : vector<2x8xf32>
    %47 = vector.multi_reduction <maximumf>, %46, %cst_21 [2] : vector<2x8x8xf32> to vector<2x8xf32>
    %48 = vector.shape_cast %47 : vector<2x8xf32> to vector<2x8x1xf32>
    %49 = vector.broadcast %48 : vector<2x8x1xf32> to vector<2x8x8xf32>
    %50 = arith.subf %46, %49 : vector<2x8x8xf32>
    %51 = math.exp %50 : vector<2x8x8xf32>
    %cst_22 = arith.constant dense<0.000000e+00> : vector<2x8xf32>
    %52 = vector.multi_reduction <add>, %51, %cst_22 [2] : vector<2x8x8xf32> to vector<2x8xf32>
    %53 = vector.shape_cast %52 : vector<2x8xf32> to vector<2x8x1xf32>
    %54 = tpu.reciprocal %53 {approx = true} : vector<2x8x1xf32> -> vector<2x8x1xf32>
    %55 = vector.broadcast %54 : vector<2x8x1xf32> to vector<2x8x8xf32>
    %56 = arith.mulf %51, %55 : vector<2x8x8xf32>
    %57 = arith.truncf %56 : vector<2x8x8xf32> to vector<2x8x8xbf16>
    "tpu.trace_start"() <{level = 10 : i32, message = "hqk,khd->qhd"}> : () -> ()
    %cst_23 = arith.constant dense<0.000000e+00> : vector<2x16x8xf32>
    %58 = tpu.matmul %42, %57, %cst_23 {dimension_numbers = #tpu.dot_dimension_numbers<[0], [2], [2], [1], [0, 1, 0, 2, 1, 1], [1], [0]>} : vector<8x2x16xbf16>, vector<2x8x8xbf16>, vector<2x16x8xf32> -> vector<2x16x8xf32>
    %59 = tpu.transpose %58, [2, 0, 1] : vector<2x16x8xf32> -> vector<8x2x16xf32>
    "tpu.trace_stop"() : () -> ()
    %60 = vector.shape_cast %59 : vector<8x2x16xf32> to vector<8x32xf32>
    %61 = arith.truncf %60 : vector<8x32xf32> to vector<8x32xbf16>
    %c0_24 = arith.constant 0 : index
    %c0_25 = arith.constant 0 : index
    %c0_26 = arith.constant 0 : index
    %62 = vector.load %arg7[%c0_24, %c0_25, %c0_26] : memref<2x32x32xbf16, #tpu.memory_space<vmem>>, vector<1x32x32xbf16>
    %63 = vector.shape_cast %62 : vector<1x32x32xbf16> to vector<32x32xbf16>
    %cst_27 = arith.constant dense<0.000000e+00> : vector<8x32xf32>
    %64 = tpu.matmul %61, %63, %cst_27 {dimension_numbers = #tpu.dot_dimension_numbers<[1], [0], [0], [1], [0, 0, 1, 1], [], []>} : vector<8x32xbf16>, vector<32x32xbf16>, vector<8x32xf32> -> vector<8x32xf32>
    %c0_28 = arith.constant 0 : index
    %c0_29 = arith.constant 0 : index
    %c0_30 = arith.constant 0 : index
    %65 = vector.load %arg8[%c0_28, %c0_29, %c0_30] : memref<2x1x32xf32, #tpu.memory_space<vmem>>, vector<1x1x32xf32>
    %66 = vector.shape_cast %65 : vector<1x1x32xf32> to vector<1x32xf32>
    %67 = vector.broadcast %66 : vector<1x32xf32> to vector<8x32xf32>
    %68 = arith.addf %64, %67 : vector<8x32xf32>
    %69 = arith.addf %68, %23 : vector<8x32xf32>
    %c0_31 = arith.constant 0 : index
    %c0_32 = arith.constant 0 : index
    %c0_33 = arith.constant 0 : index
    %70 = vector.load %arg9[%c0_31, %c0_32, %c0_33] : memref<2x1x32xf32, #tpu.memory_space<vmem>>, vector<1x1x32xf32>
    %71 = vector.shape_cast %70 : vector<1x1x32xf32> to vector<1x32xf32>
    %c0_34 = arith.constant 0 : index
    %c0_35 = arith.constant 0 : index
    %c0_36 = arith.constant 0 : index
    %72 = vector.load %arg10[%c0_34, %c0_35, %c0_36] : memref<2x1x32xf32, #tpu.memory_space<vmem>>, vector<1x1x32xf32>
    %73 = vector.shape_cast %72 : vector<1x1x32xf32> to vector<1x32xf32>
    %cst_37 = arith.constant dense<0.000000e+00> : vector<8xf32>
    %74 = vector.multi_reduction <add>, %69, %cst_37 [1] : vector<8x32xf32> to vector<8xf32>
    %75 = vector.shape_cast %74 : vector<8xf32> to vector<8x1xf32>
    %cst_38 = arith.constant 3.200000e+01 : f32
    %76 = vector.broadcast %cst_38 : f32 to vector<8x1xf32>
    %77 = arith.divf %75, %76 : vector<8x1xf32>
    %78 = vector.broadcast %77 : vector<8x1xf32> to vector<8x32xf32>
    %79 = arith.subf %69, %78 : vector<8x32xf32>
    %80 = arith.mulf %79, %79 : vector<8x32xf32>
    %cst_39 = arith.constant dense<0.000000e+00> : vector<8xf32>
    %81 = vector.multi_reduction <add>, %80, %cst_39 [1] : vector<8x32xf32> to vector<8xf32>
    %82 = vector.shape_cast %81 : vector<8xf32> to vector<8x1xf32>
    %cst_40 = arith.constant 3.200000e+01 : f32
    %83 = vector.broadcast %cst_40 : f32 to vector<8x1xf32>
    %84 = arith.divf %82, %83 : vector<8x1xf32>
    %cst_41 = arith.constant 9.99999996E-13 : f32
    %85 = vector.broadcast %cst_41 : f32 to vector<8x1xf32>
    %86 = arith.addf %84, %85 : vector<8x1xf32>
    %87 = math.rsqrt %86 : vector<8x1xf32>
    %88 = vector.broadcast %87 : vector<8x1xf32> to vector<8x32xf32>
    %89 = arith.mulf %79, %88 : vector<8x32xf32>
    %90 = vector.broadcast %71 : vector<1x32xf32> to vector<8x32xf32>
    %91 = arith.mulf %89, %90 : vector<8x32xf32>
    %92 = vector.broadcast %73 : vector<1x32xf32> to vector<8x32xf32>
    %93 = arith.addf %91, %92 : vector<8x32xf32>
    %94 = arith.truncf %93 : vector<8x32xf32> to vector<8x32xbf16>
    %c0_42 = arith.constant 0 : index
    %c0_43 = arith.constant 0 : index
    %c0_44 = arith.constant 0 : index
    %95 = vector.load %arg11[%c0_42, %c0_43, %c0_44] : memref<2x32x64xbf16, #tpu.memory_space<vmem>>, vector<1x32x64xbf16>
    %96 = vector.shape_cast %95 : vector<1x32x64xbf16> to vector<32x64xbf16>
    %cst_45 = arith.constant dense<0.000000e+00> : vector<8x64xf32>
    %97 = tpu.matmul %94, %96, %cst_45 {dimension_numbers = #tpu.dot_dimension_numbers<[1], [0], [0], [1], [0, 0, 1, 1], [], []>} : vector<8x32xbf16>, vector<32x64xbf16>, vector<8x64xf32> -> vector<8x64xf32>
    %c0_46 = arith.constant 0 : index
    %c0_47 = arith.constant 0 : index
    %c0_48 = arith.constant 0 : index
    %98 = vector.load %arg12[%c0_46, %c0_47, %c0_48] : memref<2x1x64xf32, #tpu.memory_space<vmem>>, vector<1x1x64xf32>
    %99 = vector.shape_cast %98 : vector<1x1x64xf32> to vector<1x64xf32>
    %100 = vector.broadcast %99 : vector<1x64xf32> to vector<8x64xf32>
    %101 = arith.addf %97, %100 : vector<8x64xf32>
    %cst_49 = arith.constant 5.000000e-01 : f32
    %102 = vector.broadcast %cst_49 : f32 to vector<8x64xf32>
    %103 = arith.mulf %102, %101 : vector<8x64xf32>
    %cst_50 = arith.constant 4.471500e-02 : f32
    %104 = vector.broadcast %cst_50 : f32 to vector<8x64xf32>
    %105 = arith.mulf %104, %101 : vector<8x64xf32>
    %106 = arith.mulf %105, %101 : vector<8x64xf32>
    %107 = arith.mulf %106, %101 : vector<8x64xf32>
    %108 = arith.addf %101, %107 : vector<8x64xf32>
    %cst_51 = arith.constant 0.797884583 : f32
    %109 = vector.broadcast %cst_51 : f32 to vector<8x64xf32>
    %110 = arith.mulf %109, %108 : vector<8x64xf32>
    %111 = math.tanh %110 : vector<8x64xf32>
    %cst_52 = arith.constant 1.000000e+00 : f32
    %112 = vector.broadcast %cst_52 : f32 to vector<8x64xf32>
    %113 = arith.addf %112, %111 : vector<8x64xf32>
    %114 = arith.mulf %103, %113 : vector<8x64xf32>
    %115 = arith.truncf %114 : vector<8x64xf32> to vector<8x64xbf16>
    %c0_53 = arith.constant 0 : index
    %c0_54 = arith.constant 0 : index
    %c0_55 = arith.constant 0 : index
    %116 = vector.load %arg13[%c0_53, %c0_54, %c0_55] : memref<2x64x32xbf16, #tpu.memory_space<vmem>>, vector<1x64x32xbf16>
    %117 = vector.shape_cast %116 : vector<1x64x32xbf16> to vector<64x32xbf16>
    %cst_56 = arith.constant dense<0.000000e+00> : vector<8x32xf32>
    %118 = tpu.matmul %115, %117, %cst_56 {dimension_numbers = #tpu.dot_dimension_numbers<[1], [0], [0], [1], [0, 0, 1, 1], [], []>} : vector<8x64xbf16>, vector<64x32xbf16>, vector<8x32xf32> -> vector<8x32xf32>
    %c0_57 = arith.constant 0 : index
    %c0_58 = arith.constant 0 : index
    %c0_59 = arith.constant 0 : index
    %119 = vector.load %arg14[%c0_57, %c0_58, %c0_59] : memref<2x1x32xf32, #tpu.memory_space<vmem>>, vector<1x1x32xf32>
    %120 = vector.shape_cast %119 : vector<1x1x32xf32> to vector<1x32xf32>
    %121 = vector.broadcast %120 : vector<1x32xf32> to vector<8x32xf32>
    %122 = arith.addf %118, %121 : vector<8x32xf32>
    %123 = arith.addf %122, %93 : vector<8x32xf32>
    %c0_60 = arith.constant 0 : index
    %c0_61 = arith.constant 0 : index
    %c0_62 = arith.constant 0 : index
    %124 = vector.load %arg15[%c0_60, %c0_61, %c0_62] : memref<2x1x32xf32, #tpu.memory_space<vmem>>, vector<1x1x32xf32>
    %125 = vector.shape_cast %124 : vector<1x1x32xf32> to vector<1x32xf32>
    %c0_63 = arith.constant 0 : index
    %c0_64 = arith.constant 0 : index
    %c0_65 = arith.constant 0 : index
    %126 = vector.load %arg16[%c0_63, %c0_64, %c0_65] : memref<2x1x32xf32, #tpu.memory_space<vmem>>, vector<1x1x32xf32>
    %127 = vector.shape_cast %126 : vector<1x1x32xf32> to vector<1x32xf32>
    %cst_66 = arith.constant dense<0.000000e+00> : vector<8xf32>
    %128 = vector.multi_reduction <add>, %123, %cst_66 [1] : vector<8x32xf32> to vector<8xf32>
    %129 = vector.shape_cast %128 : vector<8xf32> to vector<8x1xf32>
    %cst_67 = arith.constant 3.200000e+01 : f32
    %130 = vector.broadcast %cst_67 : f32 to vector<8x1xf32>
    %131 = arith.divf %129, %130 : vector<8x1xf32>
    %132 = vector.broadcast %131 : vector<8x1xf32> to vector<8x32xf32>
    %133 = arith.subf %123, %132 : vector<8x32xf32>
    %134 = arith.mulf %133, %133 : vector<8x32xf32>
    %cst_68 = arith.constant dense<0.000000e+00> : vector<8xf32>
    %135 = vector.multi_reduction <add>, %134, %cst_68 [1] : vector<8x32xf32> to vector<8xf32>
    %136 = vector.shape_cast %135 : vector<8xf32> to vector<8x1xf32>
    %cst_69 = arith.constant 3.200000e+01 : f32
    %137 = vector.broadcast %cst_69 : f32 to vector<8x1xf32>
    %138 = arith.divf %136, %137 : vector<8x1xf32>
    %cst_70 = arith.constant 9.99999996E-13 : f32
    %139 = vector.broadcast %cst_70 : f32 to vector<8x1xf32>
    %140 = arith.addf %138, %139 : vector<8x1xf32>
    %141 = math.rsqrt %140 : vector<8x1xf32>
    %142 = vector.broadcast %141 : vector<8x1xf32> to vector<8x32xf32>
    %143 = arith.mulf %133, %142 : vector<8x32xf32>
    %144 = vector.broadcast %125 : vector<1x32xf32> to vector<8x32xf32>
    %145 = arith.mulf %143, %144 : vector<8x32xf32>
    %146 = vector.broadcast %127 : vector<1x32xf32> to vector<8x32xf32>
    %147 = arith.addf %145, %146 : vector<8x32xf32>
    %148 = arith.truncf %147 : vector<8x32xf32> to vector<8x32xbf16>
    %c1 = arith.constant 1 : index
    %c0_71 = arith.constant 0 : index
    %c0_72 = arith.constant 0 : index
    %149 = vector.load %arg5[%c1, %c0_71, %c0_72] : memref<2x32x96xbf16, #tpu.memory_space<vmem>>, vector<1x32x96xbf16>
    %150 = vector.shape_cast %149 : vector<1x32x96xbf16> to vector<32x96xbf16>
    %cst_73 = arith.constant dense<0.000000e+00> : vector<8x96xf32>
    %151 = tpu.matmul %148, %150, %cst_73 {dimension_numbers = #tpu.dot_dimension_numbers<[1], [0], [0], [1], [0, 0, 1, 1], [], []>} : vector<8x32xbf16>, vector<32x96xbf16>, vector<8x96xf32> -> vector<8x96xf32>
    %c1_74 = arith.constant 1 : index
    %c0_75 = arith.constant 0 : index
    %c0_76 = arith.constant 0 : index
    %152 = vector.load %arg6[%c1_74, %c0_75, %c0_76] : memref<2x1x96xf32, #tpu.memory_space<vmem>>, vector<1x1x96xf32>
    %153 = vector.shape_cast %152 : vector<1x1x96xf32> to vector<1x96xf32>
    %154 = vector.broadcast %153 : vector<1x96xf32> to vector<8x96xf32>
    %155 = arith.addf %151, %154 : vector<8x96xf32>
    %156 = vector.extract_strided_slice %155 {offsets = [0, 0], sizes = [8, 32], strides = [1, 1]} : vector<8x96xf32> to vector<8x32xf32>
    %157 = vector.shape_cast %156 : vector<8x32xf32> to vector<8x2x16xf32>
    %158 = arith.truncf %157 : vector<8x2x16xf32> to vector<8x2x16xbf16>
    %159 = vector.extract_strided_slice %155 {offsets = [0, 32], sizes = [8, 32], strides = [1, 1]} : vector<8x96xf32> to vector<8x32xf32>
    %160 = vector.shape_cast %159 : vector<8x32xf32> to vector<8x2x16xf32>
    %161 = arith.truncf %160 : vector<8x2x16xf32> to vector<8x2x16xbf16>
    %162 = vector.extract_strided_slice %155 {offsets = [0, 64], sizes = [8, 32], strides = [1, 1]} : vector<8x96xf32> to vector<8x32xf32>
    %163 = vector.shape_cast %162 : vector<8x32xf32> to vector<8x2x16xf32>
    %164 = arith.truncf %163 : vector<8x2x16xf32> to vector<8x2x16xbf16>
    "tpu.trace_start"() <{level = 10 : i32, message = "qhd,khd->hqk"}> : () -> ()
    %cst_77 = arith.constant dense<0.000000e+00> : vector<2x8x8xf32>
    %165 = tpu.matmul %158, %161, %cst_77 {dimension_numbers = #tpu.dot_dimension_numbers<[2], [2], [0], [0], [0, 1, 0, 0, 1, 0], [1], [1]>} : vector<8x2x16xbf16>, vector<8x2x16xbf16>, vector<2x8x8xf32> -> vector<2x8x8xf32>
    "tpu.trace_stop"() : () -> ()
    %166 = vector.shape_cast %25 : vector<1x8xf32> to vector<1x1x8xf32>
    %167 = vector.broadcast %166 : vector<1x1x8xf32> to vector<2x8x8xf32>
    %168 = arith.addf %165, %167 : vector<2x8x8xf32>
    %cst_78 = arith.constant dense<0xFF800000> : vector<2x8xf32>
    %169 = vector.multi_reduction <maximumf>, %168, %cst_78 [2] : vector<2x8x8xf32> to vector<2x8xf32>
    %170 = vector.shape_cast %169 : vector<2x8xf32> to vector<2x8x1xf32>
    %171 = vector.broadcast %170 : vector<2x8x1xf32> to vector<2x8x8xf32>
    %172 = arith.subf %168, %171 : vector<2x8x8xf32>
    %173 = math.exp %172 : vector<2x8x8xf32>
    %cst_79 = arith.constant dense<0.000000e+00> : vector<2x8xf32>
    %174 = vector.multi_reduction <add>, %173, %cst_79 [2] : vector<2x8x8xf32> to vector<2x8xf32>
    %175 = vector.shape_cast %174 : vector<2x8xf32> to vector<2x8x1xf32>
    %176 = tpu.reciprocal %175 {approx = true} : vector<2x8x1xf32> -> vector<2x8x1xf32>
    %177 = vector.broadcast %176 : vector<2x8x1xf32> to vector<2x8x8xf32>
    %178 = arith.mulf %173, %177 : vector<2x8x8xf32>
    %179 = arith.truncf %178 : vector<2x8x8xf32> to vector<2x8x8xbf16>
    "tpu.trace_start"() <{level = 10 : i32, message = "hqk,khd->qhd"}> : () -> ()
    %cst_80 = arith.constant dense<0.000000e+00> : vector<2x16x8xf32>
    %180 = tpu.matmul %164, %179, %cst_80 {dimension_numbers = #tpu.dot_dimension_numbers<[0], [2], [2], [1], [0, 1, 0, 2, 1, 1], [1], [0]>} : vector<8x2x16xbf16>, vector<2x8x8xbf16>, vector<2x16x8xf32> -> vector<2x16x8xf32>
    %181 = tpu.transpose %180, [2, 0, 1] : vector<2x16x8xf32> -> vector<8x2x16xf32>
    "tpu.trace_stop"() : () -> ()
    %182 = vector.shape_cast %181 : vector<8x2x16xf32> to vector<8x32xf32>
    %183 = arith.truncf %182 : vector<8x32xf32> to vector<8x32xbf16>
    %c1_81 = arith.constant 1 : index
    %c0_82 = arith.constant 0 : index
    %c0_83 = arith.constant 0 : index
    %184 = vector.load %arg7[%c1_81, %c0_82, %c0_83] : memref<2x32x32xbf16, #tpu.memory_space<vmem>>, vector<1x32x32xbf16>
    %185 = vector.shape_cast %184 : vector<1x32x32xbf16> to vector<32x32xbf16>
    %cst_84 = arith.constant dense<0.000000e+00> : vector<8x32xf32>
    %186 = tpu.matmul %183, %185, %cst_84 {dimension_numbers = #tpu.dot_dimension_numbers<[1], [0], [0], [1], [0, 0, 1, 1], [], []>} : vector<8x32xbf16>, vector<32x32xbf16>, vector<8x32xf32> -> vector<8x32xf32>
    %c1_85 = arith.constant 1 : index
    %c0_86 = arith.constant 0 : index
    %c0_87 = arith.constant 0 : index
    %187 = vector.load %arg8[%c1_85, %c0_86, %c0_87] : memref<2x1x32xf32, #tpu.memory_space<vmem>>, vector<1x1x32xf32>
    %188 = vector.shape_cast %187 : vector<1x1x32xf32> to vector<1x32xf32>
    %189 = vector.broadcast %188 : vector<1x32xf32> to vector<8x32xf32>
    %190 = arith.addf %186, %189 : vector<8x32xf32>
    %191 = arith.addf %190, %147 : vector<8x32xf32>
    %c1_88 = arith.constant 1 : index
    %c0_89 = arith.constant 0 : index
    %c0_90 = arith.constant 0 : index
    %192 = vector.load %arg9[%c1_88, %c0_89, %c0_90] : memref<2x1x32xf32, #tpu.memory_space<vmem>>, vector<1x1x32xf32>
    %193 = vector.shape_cast %192 : vector<1x1x32xf32> to vector<1x32xf32>
    %c1_91 = arith.constant 1 : index
    %c0_92 = arith.constant 0 : index
    %c0_93 = arith.constant 0 : index
    %194 = vector.load %arg10[%c1_91, %c0_92, %c0_93] : memref<2x1x32xf32, #tpu.memory_space<vmem>>, vector<1x1x32xf32>
    %195 = vector.shape_cast %194 : vector<1x1x32xf32> to vector<1x32xf32>
    %cst_94 = arith.constant dense<0.000000e+00> : vector<8xf32>
    %196 = vector.multi_reduction <add>, %191, %cst_94 [1] : vector<8x32xf32> to vector<8xf32>
    %197 = vector.shape_cast %196 : vector<8xf32> to vector<8x1xf32>
    %cst_95 = arith.constant 3.200000e+01 : f32
    %198 = vector.broadcast %cst_95 : f32 to vector<8x1xf32>
    %199 = arith.divf %197, %198 : vector<8x1xf32>
    %200 = vector.broadcast %199 : vector<8x1xf32> to vector<8x32xf32>
    %201 = arith.subf %191, %200 : vector<8x32xf32>
    %202 = arith.mulf %201, %201 : vector<8x32xf32>
    %cst_96 = arith.constant dense<0.000000e+00> : vector<8xf32>
    %203 = vector.multi_reduction <add>, %202, %cst_96 [1] : vector<8x32xf32> to vector<8xf32>
    %204 = vector.shape_cast %203 : vector<8xf32> to vector<8x1xf32>
    %cst_97 = arith.constant 3.200000e+01 : f32
    %205 = vector.broadcast %cst_97 : f32 to vector<8x1xf32>
    %206 = arith.divf %204, %205 : vector<8x1xf32>
    %cst_98 = arith.constant 9.99999996E-13 : f32
    %207 = vector.broadcast %cst_98 : f32 to vector<8x1xf32>
    %208 = arith.addf %206, %207 : vector<8x1xf32>
    %209 = math.rsqrt %208 : vector<8x1xf32>
    %210 = vector.broadcast %209 : vector<8x1xf32> to vector<8x32xf32>
    %211 = arith.mulf %201, %210 : vector<8x32xf32>
    %212 = vector.broadcast %193 : vector<1x32xf32> to vector<8x32xf32>
    %213 = arith.mulf %211, %212 : vector<8x32xf32>
    %214 = vector.broadcast %195 : vector<1x32xf32> to vector<8x32xf32>
    %215 = arith.addf %213, %214 : vector<8x32xf32>
    %216 = arith.truncf %215 : vector<8x32xf32> to vector<8x32xbf16>
    %c1_99 = arith.constant 1 : index
    %c0_100 = arith.constant 0 : index
    %c0_101 = arith.constant 0 : index
    %217 = vector.load %arg11[%c1_99, %c0_100, %c0_101] : memref<2x32x64xbf16, #tpu.memory_space<vmem>>, vector<1x32x64xbf16>
    %218 = vector.shape_cast %217 : vector<1x32x64xbf16> to vector<32x64xbf16>
    %cst_102 = arith.constant dense<0.000000e+00> : vector<8x64xf32>
    %219 = tpu.matmul %216, %218, %cst_102 {dimension_numbers = #tpu.dot_dimension_numbers<[1], [0], [0], [1], [0, 0, 1, 1], [], []>} : vector<8x32xbf16>, vector<32x64xbf16>, vector<8x64xf32> -> vector<8x64xf32>
    %c1_103 = arith.constant 1 : index
    %c0_104 = arith.constant 0 : index
    %c0_105 = arith.constant 0 : index
    %220 = vector.load %arg12[%c1_103, %c0_104, %c0_105] : memref<2x1x64xf32, #tpu.memory_space<vmem>>, vector<1x1x64xf32>
    %221 = vector.shape_cast %220 : vector<1x1x64xf32> to vector<1x64xf32>
    %222 = vector.broadcast %221 : vector<1x64xf32> to vector<8x64xf32>
    %223 = arith.addf %219, %222 : vector<8x64xf32>
    %cst_106 = arith.constant 5.000000e-01 : f32
    %224 = vector.broadcast %cst_106 : f32 to vector<8x64xf32>
    %225 = arith.mulf %224, %223 : vector<8x64xf32>
    %cst_107 = arith.constant 4.471500e-02 : f32
    %226 = vector.broadcast %cst_107 : f32 to vector<8x64xf32>
    %227 = arith.mulf %226, %223 : vector<8x64xf32>
    %228 = arith.mulf %227, %223 : vector<8x64xf32>
    %229 = arith.mulf %228, %223 : vector<8x64xf32>
    %230 = arith.addf %223, %229 : vector<8x64xf32>
    %cst_108 = arith.constant 0.797884583 : f32
    %231 = vector.broadcast %cst_108 : f32 to vector<8x64xf32>
    %232 = arith.mulf %231, %230 : vector<8x64xf32>
    %233 = math.tanh %232 : vector<8x64xf32>
    %cst_109 = arith.constant 1.000000e+00 : f32
    %234 = vector.broadcast %cst_109 : f32 to vector<8x64xf32>
    %235 = arith.addf %234, %233 : vector<8x64xf32>
    %236 = arith.mulf %225, %235 : vector<8x64xf32>
    %237 = arith.truncf %236 : vector<8x64xf32> to vector<8x64xbf16>
    %c1_110 = arith.constant 1 : index
    %c0_111 = arith.constant 0 : index
    %c0_112 = arith.constant 0 : index
    %238 = vector.load %arg13[%c1_110, %c0_111, %c0_112] : memref<2x64x32xbf16, #tpu.memory_space<vmem>>, vector<1x64x32xbf16>
    %239 = vector.shape_cast %238 : vector<1x64x32xbf16> to vector<64x32xbf16>
    %cst_113 = arith.constant dense<0.000000e+00> : vector<8x32xf32>
    %240 = tpu.matmul %237, %239, %cst_113 {dimension_numbers = #tpu.dot_dimension_numbers<[1], [0], [0], [1], [0, 0, 1, 1], [], []>} : vector<8x64xbf16>, vector<64x32xbf16>, vector<8x32xf32> -> vector<8x32xf32>
    %c1_114 = arith.constant 1 : index
    %c0_115 = arith.constant 0 : index
    %c0_116 = arith.constant 0 : index
    %241 = vector.load %arg14[%c1_114, %c0_115, %c0_116] : memref<2x1x32xf32, #tpu.memory_space<vmem>>, vector<1x1x32xf32>
    %242 = vector.shape_cast %241 : vector<1x1x32xf32> to vector<1x32xf32>
    %243 = vector.broadcast %242 : vector<1x32xf32> to vector<8x32xf32>
    %244 = arith.addf %240, %243 : vector<8x32xf32>
    %245 = arith.addf %244, %215 : vector<8x32xf32>
    %c1_117 = arith.constant 1 : index
    %c0_118 = arith.constant 0 : index
    %c0_119 = arith.constant 0 : index
    %246 = vector.load %arg15[%c1_117, %c0_118, %c0_119] : memref<2x1x32xf32, #tpu.memory_space<vmem>>, vector<1x1x32xf32>
    %247 = vector.shape_cast %246 : vector<1x1x32xf32> to vector<1x32xf32>
    %c1_120 = arith.constant 1 : index
    %c0_121 = arith.constant 0 : index
    %c0_122 = arith.constant 0 : index
    %248 = vector.load %arg16[%c1_120, %c0_121, %c0_122] : memref<2x1x32xf32, #tpu.memory_space<vmem>>, vector<1x1x32xf32>
    %249 = vector.shape_cast %248 : vector<1x1x32xf32> to vector<1x32xf32>
    %cst_123 = arith.constant dense<0.000000e+00> : vector<8xf32>
    %250 = vector.multi_reduction <add>, %245, %cst_123 [1] : vector<8x32xf32> to vector<8xf32>
    %251 = vector.shape_cast %250 : vector<8xf32> to vector<8x1xf32>
    %cst_124 = arith.constant 3.200000e+01 : f32
    %252 = vector.broadcast %cst_124 : f32 to vector<8x1xf32>
    %253 = arith.divf %251, %252 : vector<8x1xf32>
    %254 = vector.broadcast %253 : vector<8x1xf32> to vector<8x32xf32>
    %255 = arith.subf %245, %254 : vector<8x32xf32>
    %256 = arith.mulf %255, %255 : vector<8x32xf32>
    %cst_125 = arith.constant dense<0.000000e+00> : vector<8xf32>
    %257 = vector.multi_reduction <add>, %256, %cst_125 [1] : vector<8x32xf32> to vector<8xf32>
    %258 = vector.shape_cast %257 : vector<8xf32> to vector<8x1xf32>
    %cst_126 = arith.constant 3.200000e+01 : f32
    %259 = vector.broadcast %cst_126 : f32 to vector<8x1xf32>
    %260 = arith.divf %258, %259 : vector<8x1xf32>
    %cst_127 = arith.constant 9.99999996E-13 : f32
    %261 = vector.broadcast %cst_127 : f32 to vector<8x1xf32>
    %262 = arith.addf %260, %261 : vector<8x1xf32>
    %263 = math.rsqrt %262 : vector<8x1xf32>
    %264 = vector.broadcast %263 : vector<8x1xf32> to vector<8x32xf32>
    %265 = arith.mulf %255, %264 : vector<8x32xf32>
    %266 = vector.broadcast %247 : vector<1x32xf32> to vector<8x32xf32>
    %267 = arith.mulf %265, %266 : vector<8x32xf32>
    %268 = vector.broadcast %249 : vector<1x32xf32> to vector<8x32xf32>
    %269 = arith.addf %267, %268 : vector<8x32xf32>
    %270 = arith.truncf %269 : vector<8x32xf32> to vector<8x32xbf16>
    %c0_128 = arith.constant 0 : index
    %c0_129 = arith.constant 0 : index
    %271 = vector.load %arg17[%c0_128, %c0_129] : memref<32x32xbf16, #tpu.memory_space<vmem>>, vector<32x32xbf16>
    %cst_130 = arith.constant dense<0.000000e+00> : vector<8x32xf32>
    %272 = tpu.matmul %270, %271, %cst_130 {dimension_numbers = #tpu.dot_dimension_numbers<[1], [0], [0], [1], [0, 0, 1, 1], [], []>} : vector<8x32xbf16>, vector<32x32xbf16>, vector<8x32xf32> -> vector<8x32xf32>
    %c0_131 = arith.constant 0 : index
    %c0_132 = arith.constant 0 : index
    %273 = vector.load %arg18[%c0_131, %c0_132] : memref<1x32xf32, #tpu.memory_space<vmem>>, vector<1x32xf32>
    %274 = vector.broadcast %273 : vector<1x32xf32> to vector<8x32xf32>
    %275 = arith.addf %272, %274 : vector<8x32xf32>
    %276 = math.tanh %275 : vector<8x32xf32>
    %277 = arith.truncf %276 : vector<8x32xf32> to vector<8x32xbf16>
    %c0_133 = arith.constant 0 : index
    %c0_134 = arith.constant 0 : index
    %278 = vector.load %arg19[%c0_133, %c0_134] : memref<32x128xbf16, #tpu.memory_space<vmem>>, vector<32x128xbf16>
    %cst_135 = arith.constant dense<0.000000e+00> : vector<8x128xf32>
    %279 = tpu.matmul %277, %278, %cst_135 {dimension_numbers = #tpu.dot_dimension_numbers<[1], [0], [0], [1], [0, 0, 1, 1], [], []>} : vector<8x32xbf16>, vector<32x128xbf16>, vector<8x128xf32> -> vector<8x128xf32>
    %c0_136 = arith.constant 0 : index
    %c0_137 = arith.constant 0 : index
    %280 = vector.load %arg20[%c0_136, %c0_137] : memref<1x128xf32, #tpu.memory_space<vmem>>, vector<1x128xf32>
    %281 = vector.broadcast %280 : vector<1x128xf32> to vector<8x128xf32>
    %282 = arith.addf %279, %281 : vector<8x128xf32>
    %c0_138 = arith.constant 0 : index
    %c0_139 = arith.constant 0 : index
    %c0_140 = arith.constant 0 : index
    %283 = vector.load %arg21[%c0_138, %c0_139, %c0_140] : memref<1x8x128xf32, #tpu.memory_space<vmem>>, vector<1x8x128xf32>
    %284 = vector.shape_cast %283 : vector<1x8x128xf32> to vector<8x128xf32>
    %285 = vector.shape_cast %282 : vector<8x128xf32> to vector<1x8x128xf32>
    tpu.vector_store %arg21[%c0_138, %c0_139, %c0_140], %285 {strides = array<i32>} : memref<1x8x128xf32, #tpu.memory_space<vmem>>, vector<1x8x128xf32>,
    return
  }
  func.func @transform_0(%arg0: i32) -> (i32, i32, i32) {
    %c0_i32 = arith.constant 0 : i32
    %c0_i32_0 = arith.constant 0 : i32
    %c0_i32_1 = arith.constant 0 : i32
    return %arg0, %c0_i32, %c0_i32_0 : i32, i32, i32
  }
  func.func @transform_1(%arg0: i32) -> (i32, i32, i32) {
    %c0_i32 = arith.constant 0 : i32
    %c0_i32_0 = arith.constant 0 : i32
    %c0_i32_1 = arith.constant 0 : i32
    return %arg0, %c0_i32, %c0_i32_0 : i32, i32, i32
  }
  func.func @transform_2(%arg0: i32) -> (i32, i32) {
    %c0_i32 = arith.constant 0 : i32
    %c0_i32_0 = arith.constant 0 : i32
    %c0_i32_1 = arith.constant 0 : i32
    return %c0_i32, %c0_i32_0 : i32, i32
  }
  func.func @transform_3(%arg0: i32) -> (i32, i32) {
    %c0_i32 = arith.constant 0 : i32
    %c0_i32_0 = arith.constant 0 : i32
    %c0_i32_1 = arith.constant 0 : i32
    return %c0_i32, %c0_i32_0 : i32, i32
  }
  func.func @transform_4(%arg0: i32) -> (i32, i32, i32) {
    %c0_i32 = arith.constant 0 : i32
    %c0_i32_0 = arith.constant 0 : i32
    %c0_i32_1 = arith.constant 0 : i32
    %c0_i32_2 = arith.constant 0 : i32
    return %c0_i32, %c0_i32_0, %c0_i32_1 : i32, i32, i32
  }
  func.func @transform_5(%arg0: i32) -> (i32, i32, i32) {
    %c0_i32 = arith.constant 0 : i32
    %c0_i32_0 = arith.constant 0 : i32
    %c0_i32_1 = arith.constant 0 : i32
    %c0_i32_2 = arith.constant 0 : i32
    return %c0_i32, %c0_i32_0, %c0_i32_1 : i32, i32, i32
  }
  func.func @transform_6(%arg0: i32) -> (i32, i32, i32) {
    %c0_i32 = arith.constant 0 : i32
    %c0_i32_0 = arith.constant 0 : i32
    %c0_i32_1 = arith.constant 0 : i32
    %c0_i32_2 = arith.constant 0 : i32
    return %c0_i32, %c0_i32_0, %c0_i32_1 : i32, i32, i32
  }
  func.func @transform_7(%arg0: i32) -> (i32, i32, i32) {
    %c0_i32 = arith.constant 0 : i32
    %c0_i32_0 = arith.constant 0 : i32
    %c0_i32_1 = arith.constant 0 : i32
    %c0_i32_2 = arith.constant 0 : i32
    return %c0_i32, %c0_i32_0, %c0_i32_1 : i32, i32, i32
  }
  func.func @transform_8(%arg0: i32) -> (i32, i32, i32) {
    %c0_i32 = arith.constant 0 : i32
    %c0_i32_0 = arith.constant 0 : i32
    %c0_i32_1 = arith.constant 0 : i32
    %c0_i32_2 = arith.constant 0 : i32
    return %c0_i32, %c0_i32_0, %c0_i32_1 : i32, i32, i32
  }
  func.func @transform_9(%arg0: i32) -> (i32, i32, i32) {
    %c0_i32 = arith.constant 0 : i32
    %c0_i32_0 = arith.constant 0 : i32
    %c0_i32_1 = arith.constant 0 : i32
    %c0_i32_2 = arith.constant 0 : i32
    return %c0_i32, %c0_i32_0, %c0_i32_1 : i32, i32, i32
  }
  func.func @transform_10(%arg0: i32) -> (i32, i32, i32) {
    %c0_i32 = arith.constant 0 : i32
    %c0_i32_0 = arith.constant 0 : i32
    %c0_i32_1 = arith.constant 0 : i32
    %c0_i32_2 = arith.constant 0 : i32
    return %c0_i32, %c0_i32_0, %c0_i32_1 : i32, i32, i32
  }
  func.func @transform_11(%arg0: i32) -> (i32, i32, i32) {
    %c0_i32 = arith.constant 0 : i32
    %c0_i32_0 = arith.constant 0 : i32
    %c0_i32_1 = arith.constant 0 : i32
    %c0_i32_2 = arith.constant 0 : i32
    return %c0_i32, %c0_i32_0, %c0_i32_1 : i32, i32, i32
  }
  func.func @transform_12(%arg0: i32) -> (i32, i32, i32) {
    %c0_i32 = arith.constant 0 : i32
    %c0_i32_0 = arith.constant 0 : i32
    %c0_i32_1 = arith.constant 0 : i32
    %c0_i32_2 = arith.constant 0 : i32
    return %c0_i32, %c0_i32_0, %c0_i32_1 : i32, i32, i32
  }
  func.func @transform_13(%arg0: i32) -> (i32, i32, i32) {
    %c0_i32 = arith.constant 0 : i32
    %c0_i32_0 = arith.constant 0 : i32
    %c0_i32_1 = arith.constant 0 : i32
    %c0_i32_2 = arith.constant 0 : i32
    return %c0_i32, %c0_i32_0, %c0_i32_1 : i32, i32, i32
  }
  func.func @transform_14(%arg0: i32) -> (i32, i32, i32) {
    %c0_i32 = arith.constant 0 : i32
    %c0_i32_0 = arith.constant 0 : i32
    %c0_i32_1 = arith.constant 0 : i32
    %c0_i32_2 = arith.constant 0 : i32
    return %c0_i32, %c0_i32_0, %c0_i32_1 : i32, i32, i32
  }
  func.func @transform_15(%arg0: i32) -> (i32, i32, i32) {
    %c0_i32 = arith.constant 0 : i32
    %c0_i32_0 = arith.constant 0 : i32
    %c0_i32_1 = arith.constant 0 : i32
    %c0_i32_2 = arith.constant 0 : i32
    return %c0_i32, %c0_i32_0, %c0_i32_1 : i32, i32, i32
  }
  func.func @transform_16(%arg0: i32) -> (i32, i32) {
    %c0_i32 = arith.constant 0 : i32
    %c0_i32_0 = arith.constant 0 : i32
    %c0_i32_1 = arith.constant 0 : i32
    return %c0_i32, %c0_i32_0 : i32, i32
  }
  func.func @transform_17(%arg0: i32) -> (i32, i32) {
    %c0_i32 = arith.constant 0 : i32
    %c0_i32_0 = arith.constant 0 : i32
    %c0_i32_1 = arith.constant 0 : i32
    return %c0_i32, %c0_i32_0 : i32, i32
  }
  func.func @transform_18(%arg0: i32) -> (i32, i32) {
    %c0_i32 = arith.constant 0 : i32
    %c0_i32_0 = arith.constant 0 : i32
    %c0_i32_1 = arith.constant 0 : i32
    return %c0_i32, %c0_i32_0 : i32, i32
  }
  func.func @transform_19(%arg0: i32) -> (i32, i32) {
    %c0_i32 = arith.constant 0 : i32
    %c0_i32_0 = arith.constant 0 : i32
    %c0_i32_1 = arith.constant 0 : i32
    return %c0_i32, %c0_i32_0 : i32, i32
  }
  func.func @transform_20(%arg0: i32) -> (i32, i32, i32) {
    %c0_i32 = arith.constant 0 : i32
    %c0_i32_0 = arith.constant 0 : i32
    %c0_i32_1 = arith.constant 0 : i32
    return %arg0, %c0_i32, %c0_i32_0 : i32, i32, i32
  }
}

</mosaic_0001>

<bundles_post_ra>
// kernel: _lambda_.1
= control target key start
LH: loop header
LB: loop body
LE: loop exit
PB: predicated region body
PF: predicated region fallthrough
CT: control target
= control target key end

     0   :  { %s6696_s0 = inlined_call_operand.vmem [shape: f32[2,8,32], index: 0, kind: input, shape index: {}]   ;;  %s6697_s1 = inlined_call_operand.vmem [shape: f32[2,1,8], index: 1, kind: input, shape index: {}]   ;;  %s6698_s2 = inlined_call_operand.vmem [shape: f32[1,32], index: 2, kind: input, shape index: {}]   ;;  %s6699_s3 = inlined_call_operand.vmem [shape: f32[1,32], index: 3, kind: input, shape index: {}]   ;;  %s6700_s4 = inlined_call_operand.vmem [shape: bf16[2,32,96], index: 4, kind: input, shape index: {}]   ;;  %s6701_s5 = inlined_call_operand.vmem [shape: f32[2,1,96], index: 5, kind: input, shape index: {}]   ;;  %s6702_s6 = inlined_call_operand.vmem [shape: bf16[2,32,32], index: 6, kind: input, shape index: {}]   ;;  %s6703_s7 = inlined_call_operand.vmem [shape: f32[2,1,32], index: 7, kind: input, shape index: {}]   ;;  %s6704_s8 = inlined_call_operand.vmem [shape: f32[2,1,32], index: 8, kind: input, shape index: {}]   ;;  %s6705_s9 = inlined_call_operand.vmem [shape: f32[2,1,32], index: 9, kind: input, shape index: {}]   ;;  %s6706_s10 = inlined_call_operand.vmem [shape: bf16[2,32,64], index: 10, kind: input, shape index: {}]   ;;  %s6707_s11 = inlined_call_operand.vmem [shape: f32[2,1,64], index: 11, kind: input, shape index: {}]   ;;  %s6708_s12 = inlined_call_operand.vmem [shape: bf16[2,64,32], index: 12, kind: input, shape index: {}]   ;;  %s6709_s13 = inlined_call_operand.vmem [shape: f32[2,1,32], index: 13, kind: input, shape index: {}]   ;;  %s6710_s14 = inlined_call_operand.vmem [shape: f32[2,1,32], index: 14, kind: input, shape index: {}]   ;;  %s6711_s15 = inlined_call_operand.vmem [shape: f32[2,1,32], index: 15, kind: input, shape index: {}]   ;;  %s6712_s16 = inlined_call_operand.vmem [shape: bf16[32,32], index: 16, kind: input, shape index: {}]   ;;  %s6713_s17 = inlined_call_operand.vmem [shape: f32[1,32], index: 17, kind: input, shape index: {}]   ;;  %s6714_s18 = inlined_call_operand.vmem [shape: bf16[32,128], index: 18, kind: input, shape index: {}]   ;;  %s6715_s19 = inlined_call_operand.vmem [shape: f32[1,128], index: 19, kind: input, shape index: {}]   ;;  %s6716_s20 = inlined_call_operand.vmem [shape: f32[2,8,128], index: 20, kind: output, shape index: {}]  }
   0x1   :  { %6720 = sst [smem:[#allocation2_spill]] %s6696_s0 }
   0x2   :  { %6721 = sst [smem:[#allocation3_spill]] %s6697_s1  ;;  %s6082_s1 = smov 0  }
   0x3   :  { %6722 = sst [smem:[#allocation4_spill]] %s6698_s2 }
   0x4   :  { %6723 = sst [smem:[#allocation5_spill]] %s6699_s3 }
   0x5   :  { %6724 = sst [smem:[#allocation6_spill]] %s6700_s4 }
   0x6 LB: > { %s5588_s22 = sadd.s32 4294967295, %s5966_s1   ;;  %p5592_p0 = scmp.ge.s32.totalorder %s5966_s1, 1  ;;  %s5966_s1 = sphi %s6082_s1, %s30_s1  }
   0x7   : > { %p569_p1 = scmp.lt.s32.totalorder %s5966_s1, 3 }
   0x9   : > { %p570_p2 = pnand %p5592_p0, %p569_p1 }
   0xa   : > { %p628_p3 = scmp.lt.s32.totalorder (!%p570_p2), %s5588_s22, 1  ;;  %s6725_s25 = sld [smem:[#allocation2_spill]] (!%p570_p2) }
   0xb   : > { %573 = sbr.rel (%p570_p2) target bundleno = 6654 (0x19fe), region = 100  ;;  %s6726_s28 = sld [smem:[#allocation6_spill]] (!%p570_p2) }
   0xc   : > { %s6727_s21 = sld [smem:[#allocation4_spill]] (!%p570_p2)  ;;  %s5970_s27 = smov (!%p570_p2), 112  }
   0xd   : > { %s5971_s4 = smov (!%p570_p2), 96   ;;  %s5975_s29 = smov (!%p570_p2), 64  }
   0xe   : > { %s6719_s30 = smov (!%p570_p2), 16   ;;  %s6730_s2 = smov (!%p570_p2), 16  }
  0x10   : > { %s6733_s22 = smov (!%p628_p3, %s5588_s22), 1  ;;  %vm643_vm0 = vcmask 261120   ;;  %v5968_v8 = vmov 0.0   ;;  %vm5969_vm1 = vmmov 0   ;;  %v5597_v20 = vld [vmem:[%s6701_s5] ss:$0 sm:$0xff]  ;;  %v748_v29 = vlaneseq }
  0x11   : > { %s6718_s23 = sshll.u32 %s6733_s22, 3  ;;  %v5903_v7 = vld [vmem:[%s6726_s28 + $0x8] sm:$0xff]   ;;  %5750 = vmatprep.subr.bf16.mxu0 %v5968_v8  ;;  %5754 = vmatprep.mubr.msk.bf16.mxu0 %vm5969_vm1, %v5968_v8  ;;  %v5904_v9 = vld [vmem:[%s6726_s28] sm:$0xff]   ;;  %v5972_v27 = vmov 1983009808   ;;  %vm1696_vm2 = vcmask 130048  }
  0x12   : > { %s631_s3 = scalar_lea.vmem %s6725_s25, %s6718_s23  ;;  %5751 = vmatpush3.bf16.msra.mxu0 %v5903_v7  ;;  %5758 = vmatprep.subr.bf16.mxu1 %v5968_v8  ;;  %v5595_v14 = vld [vmem:[%s6727_s21] ss:$0 sm:$0xff]  ;;  %s6728_s25 = sld [smem:[#allocation5_spill]]  ;;  %v746_v28 = vunpack.c.l.s4 %v5972_v27  ;;  %v5973_v30 = vmov 1934713408   ;;  %v749_v33 = vshrl.u32 %v748_v29, 7 }
  0x13   : > { %v640_v0 = vld [vmem:[%s631_s3] sm:$0xff]  ;;  %5752 = vmatprep.subr.bf16.mxu0 %v5968_v8  ;;  %5760 = vmatprep.mubr.msk.bf16.mxu1 %vm5969_vm1, %v5968_v8  ;;  %v777_v31 = vunpack.c.l.s4 %v5973_v30  ;;  %s6729_s21 = sld [smem:[#allocation3_spill]]  ;;  %vm1783_vm3 = vcmask 64512   ;;  %vm2956_vm4 = vcmask 523264   ;;  %s6731_s26 = sshll.u32 %s6733_s22, 3 }
  0x14   : > { %v644_v1 = vsel %vm643_vm0, %v640_v0, 0.0  ;;  %v747_v32 = vunpack.c.0.s8 %v746_v28  ;;  %s638_s0 = scalar_lea.vmem %s6716_s20, %s6731_s26 }
  0x15   : > { %645 = vadd.xlane.f32.xlu0 %v644_v1  ;;  %v778_v35 = vunpack.c.0.s8 %v777_v31 }
  0x16   : > { %5753 = vmatpush3.bf16.msra.mxu0 %v5904_v9  ;;  %v6140_v36 = vsub.s32 %v747_v32, %v749_v33 }
  0x17   : > { %5770 = vmatprep.subr.bf16.mxu0 %v5968_v8  ;;  %v6146_v42 = vsub.s32 %v778_v35, %v749_v33 }
  0x18   : > { %v5596_v16 = vld [vmem:[%s6728_s25] ss:$0 sm:$0xff] }
  0x19   : > { %s6240_s24 = scalar_lea.vmem %s6729_s21, %s6733_s22 }
  0x9e   : > { %v646_v2 = vpop.xlane.xlu0 %645 }
  0x9f   : > { %v648_v3 = vmul.f32 0.03125, %v646_v2 }
  0xa1   : > { %v649_v4 = vsub.f32 %v640_v0, %v648_v3 }
  0xa3   : > { %v650_v5 = vmul.f32 %v649_v4, %v649_v4 }
  0xa5   : > { %v651_v6 = vsel %vm643_vm0, %v650_v5, 0.0 }
  0xa6   : > { %652 = vadd.xlane.f32.xlu0 %v651_v6 }
 0x12f   : > { %v653_v10 = vpop.xlane.xlu0 %652 }
 0x130   : > { %v654_v11 = vmul.f32 0.03125, %v653_v10 }
 0x132   : > { %v655_v12 = vadd.f32 1e-12, %v654_v11 }
 0x134   : > { %5927 = vrsqrt.f32 %v655_v12 }
 0x141   : > { %v5928_v13 = vpop.eup %5927 }
 0x142   : > { %v657_v15 = vmul.f32 %v5928_v13, %v649_v4 }
 0x144   : > { %v664_v17 = vmul.f32 %v5595_v14, %v657_v15 }
 0x146   : > { %v6120_v18 = vadd.f32 %v5596_v16, %v664_v17 }
 0x148   : > { %v673_v19 = vpack.c.bf16 %v6120_v18, %v6120_v18 }
 0x14a   : > { %5755 = vmatmul.mubr.msk.bf16.vlgmr.msra.gmra.mxu0 %vm643_vm0, %v673_v19 }
 0x14b   : > { %5772 = vmatprep.mubr.msk.bf16.mxu0 %vm5969_vm1, %v5968_v8 }
 0x20a   : > { %v734_v21 = vpop.f32.mrf.mxu0 }
 0x20b   : > { %v6130_v22 = vadd.f32 %v5597_v20, %v734_v21 }
 0x20c   : > { %v5756_v23 = vpop.f32.mrf.mxu0 }
 0x20d   : > { %741 = vrot.lane.b32.xlu1 %v6130_v22, %s5970_s27 }
 0x20e   : > { %v737_v24 = vpop.f32.mrf.mxu0 }
 0x210   : > { %v5757_v25 = vpop.f32.mrf.mxu0 }
 0x211   : > { %818 = vrot.lane.b32.xlu1 %v6130_v22, %s5971_s4 }
 0x27f   : > { %v6136_v26 = vpop.permute.xlu1 %741 }
 0x280   : > { %820 = vrot.lane.b32.xlu0 %v6136_v26, %s5971_s4 }
 0x283   : > { %v819_v34 = vpop.permute.xlu1 %818 }
 0x284   : > { %v824_v37 = vcombine.high %v819_v34, %v5968_v8  ;;  %v831_v39 = vrot.slane %v819_v34, %v6140_v36 }
 0x286   : > { %v838_v43 = vrot.slane %v824_v37, %v6140_v36 }
 0x2f2   : > { %v821_v38 = vpop.permute.xlu0 %820 }
 0x2f3   : > { %v839_v40 = vcombine.high %v821_v38, %v5968_v8  ;;  %v846_v41 = vrot.slane %v821_v38, %v6140_v36 }
 0x2f5   : > { %v853_v44 = vrot.slane %v839_v40, %v6140_v36  ;;  %v854_v45 = vcombine.low %v831_v39, %v846_v41  ;;  %v855_v46 = vcombine.high %v831_v39, %v846_v41 }
 0x2f7   : > { %v862_v47 = vrot.slane %v854_v45, %v6146_v42  ;;  %v871_v48 = vcombine.high %v838_v43, %v853_v44  ;;  %v869_v51 = vrot.slane %v855_v46, %v6146_v42  ;;  %v870_v57 = vcombine.low %v838_v43, %v853_v44 }
 0x2f9   : > { %v890_v49 = vpack.c.bf16 %v862_v47, %v862_v47  ;;  %v886_v50 = vcombine.high %v862_v47, %v5968_v8  ;;  %v885_v52 = vrot.slane %v871_v48, %v6146_v42  ;;  %v892_v55 = vpack.c.bf16 %v869_v51, %v869_v51 }
 0x2fa   : > { %v887_v56 = vcombine.high %v869_v51, %v5968_v8  ;;  %v878_v60 = vrot.slane %v870_v57, %v6146_v42 }
 0x2fb   : > { %1038 = vxpose.xlu1.c.b16.start.end [1/1] (short) (narrow) %v890_v49, 16  ;;  %v891_v53 = vpack.c.bf16 %v886_v50, %v886_v50  ;;  %v889_v54 = vcombine.high %v885_v52, %v5968_v8  ;;  %v896_v0 = vpack.c.bf16 %v885_v52, %v885_v52 }
 0x2fc   : > { %v893_v59 = vpack.c.bf16 %v887_v56, %v887_v56  ;;  %v894_v61 = vpack.c.bf16 %v878_v60, %v878_v60  ;;  %v888_v62 = vcombine.high %v878_v60, %v5968_v8 }
 0x2fd   : > { %1054 = vxpose.xlu0.c.b16.start.end [1/1] (short) (narrow) %v891_v53, 16  ;;  %v897_v58 = vpack.c.bf16 %v889_v54, %v889_v54 }
 0x2fe   : > { %v895_v63 = vpack.c.bf16 %v888_v62, %v888_v62 }
 0x2ff   : > { %1070 = vxpose.xlu1.c.b16.start.end [1/1] (short) (narrow) %v892_v55, 16 }
 0x301   : > { %1150 = vxpose.xlu0.c.b16.start.end [1/1] (short) (narrow) %v897_v58, 16 }
 0x303   : > { %1086 = vxpose.xlu1.c.b16.start.end [1/1] (short) (narrow) %v893_v59, 16 }
 0x307   : > { %1102 = vxpose.xlu1.c.b16.start.end [1/1] (short) (narrow) %v894_v61, 16 }
 0x30b   : > { %1118 = vxpose.xlu1.c.b16.start.end [1/1] (short) (narrow) %v895_v63, 16  ;;  %v5974_v63 = vmov 0  }
 0x30f   : > { %1134 = vxpose.xlu1.c.b16.start.end [1/1] (short) (narrow) %v896_v0, 16 }
 0x35d   : > { %v1046_v1 = vpop.trf.xlu1 }
 0x35e   : > { %v1170_v13 = vshrl.u32 %v1046_v1, 16 }
 0x35f   : > { %v1062_v4 = vpop.trf.xlu0 }
 0x360   : > { %v1171_v6 = vshrl.u32 %v1062_v4, 16  ;;  %v1168_v14 = vpack.i.b16 %v1062_v4, %v1046_v1 }
 0x361   : > { %v1078_v2 = vpop.trf.xlu1 }
 0x362   : > { %v1172_v19 = vpack.i.b16 %v1171_v6, %v1170_v13  ;;  %v1178_v20 = vshrl.u32 %v1078_v2, 16  ;;  %v759_v13 = vcombine.high %v6136_v26, %v5968_v8 }
 0x363   : > { %v1158_v9 = vpop.trf.xlu0 }
 0x364   : > { %v1195_v17 = vshrl.u32 %v1158_v9, 16 }
 0x365   : > { %v1094_v3 = vpop.trf.xlu1 }
 0x366   : > { %v1179_v15 = vshrl.u32 %v1094_v3, 16  ;;  %v1176_v23 = vpack.i.b16 %v1094_v3, %v1078_v2 }
 0x368   : > { %v1180_v28 = vpack.i.b16 %v1179_v15, %v1178_v20  ;;  %v744_v15 = vcombine.high %v6130_v22, %v5968_v8 }
 0x369   : > { %v1110_v5 = vpop.trf.xlu1 }
 0x36a   : > { %v1186_v10 = vshrl.u32 %v1110_v5, 16  ;;  %v758_v20 = vrot.slane %v744_v15, %v6140_v36 }
 0x36d   : > { %v1126_v7 = vpop.trf.xlu1 }
 0x36e   : > { %v1184_v11 = vpack.i.b16 %v1126_v7, %v1110_v5  ;;  %v1187_v12 = vshrl.u32 %v1126_v7, 16 }
 0x370   : > { %v1188_v16 = vpack.i.b16 %v1187_v12, %v1186_v10  ;;  %v1198_v24 = vcombine.low %v1168_v14, %v1184_v11  ;;  %v1199_v37 = vcombine.high %v1168_v14, %v1184_v11 }
 0x371   : > { %v1142_v21 = vpop.trf.xlu1 }
 0x372   : > { %v1192_v25 = vpack.i.b16 %v1158_v9, %v1142_v21  ;;  %v1194_v27 = vshrl.u32 %v1142_v21, 16  ;;  %v1266_v31 = vcombine.low %v1172_v19, %v1188_v16  ;;  %v1206_v33 = vrot.slane %v1198_v24, %v6140_v36 }
 0x373   : > { %v1267_v43 = vcombine.high %v1172_v19, %v1188_v16  ;;  %v1213_v50 = vrot.slane %v1199_v37, %v6140_v36  ;;  %v766_v21 = vrot.slane %v6136_v26, %v6140_v36  ;;  %v751_v24 = vrot.slane %v6130_v22, %v6140_v36 }
 0x374   : > { %v1196_v29 = vpack.i.b16 %v1195_v17, %v1194_v27  ;;  %v1214_v30 = vcombine.low %v1176_v23, %v1192_v25  ;;  %v1215_v32 = vcombine.high %v1176_v23, %v1192_v25  ;;  %v1274_v39 = vrot.slane %v1266_v31, %v6140_v36 }
 0x375   : > { %v1281_v54 = vrot.slane %v1267_v43, %v6140_v36  ;;  %v773_v17 = vrot.slane %v759_v13, %v6140_v36 }
 0x376   : > { %v1222_v34 = vrot.slane %v1214_v30, %v6140_v36  ;;  %v1282_v35 = vcombine.low %v1180_v28, %v1196_v29  ;;  %v1283_v41 = vcombine.high %v1180_v28, %v1196_v29  ;;  %v1229_v47 = vrot.slane %v1215_v32, %v6140_v36 }
 0x377   : > { %v790_v25 = vcombine.low %v758_v20, %v773_v17  ;;  %v791_v27 = vcombine.high %v758_v20, %v773_v17  ;;  %v774_v29 = vcombine.low %v751_v24, %v766_v21  ;;  %v775_v30 = vcombine.high %v751_v24, %v766_v21 }
 0x378   : > { %v1230_v38 = vcombine.low %v1206_v33, %v1222_v34  ;;  %v1290_v40 = vrot.slane %v1282_v35, %v6140_v36  ;;  %v1231_v46 = vcombine.high %v1206_v33, %v1222_v34  ;;  %v1297_v51 = vrot.slane %v1283_v41, %v6140_v36 }
 0x379   : > { %v1246_v53 = vcombine.low %v1213_v50, %v1229_v47  ;;  %v1247_v58 = vcombine.high %v1213_v50, %v1229_v47  ;;  %v798_v32 = vrot.slane %v790_v25, %v6146_v42  ;;  %v805_v33 = vrot.slane %v791_v27, %v6146_v42 }
 0x37a   : > { %v1238_v44 = vrot.slane %v1230_v38, %v6146_v42  ;;  %v1298_v45 = vcombine.low %v1274_v39, %v1290_v40  ;;  %v1299_v49 = vcombine.high %v1274_v39, %v1290_v40  ;;  %v1245_v52 = vrot.slane %v1231_v46, %v6146_v42 }
 0x37b   : > { %v1314_v56 = vcombine.low %v1281_v54, %v1297_v51  ;;  %v1254_v57 = vrot.slane %v1246_v53, %v6146_v42  ;;  %v1315_v60 = vcombine.high %v1281_v54, %v1297_v51  ;;  %v1261_v61 = vrot.slane %v1247_v58, %v6146_v42 }
 0x37c   : > { %1334 = vxpose.xlu1.c.b16.start.end [1/1] (short) (narrow) %v1238_v44, 16  ;;  %v1306_v48 = vrot.slane %v1298_v45, %v6146_v42  ;;  %v1313_v55 = vrot.slane %v1299_v49, %v6146_v42  ;;  %v1262_v0 = vcombine.high %v1238_v44, %v5974_v63  ;;  %v1263_v2 = vcombine.high %v1245_v52, %v5974_v63 }
 0x37d   : > { %v1322_v59 = vrot.slane %v1314_v56, %v6146_v42  ;;  %v1329_v62 = vrot.slane %v1315_v60, %v6146_v42  ;;  %v1264_v4 = vcombine.high %v1254_v57, %v5974_v63  ;;  %v1265_v6 = vcombine.high %v1261_v61, %v5974_v63 }
 0x37e   : > { %1350 = vxpose.xlu0.c.b16.start.end [1/1] (short) (narrow) %v1306_v48, 16  ;;  %v1330_v1 = vcombine.high %v1306_v48, %v5974_v63  ;;  %v1331_v3 = vcombine.high %v1313_v55, %v5974_v63  ;;  %v782_v35 = vrot.slane %v774_v29, %v6146_v42  ;;  %v789_v37 = vrot.slane %v775_v30, %v6146_v42 }
 0x37f   : > { %v1332_v5 = vcombine.high %v1322_v59, %v5974_v63  ;;  %v1333_v7 = vcombine.high %v1329_v62, %v5974_v63  ;;  %v808_v38 = vcombine.high %v798_v32, %v5968_v8 }
 0x380   : > { %1398 = vxpose.xlu1.c.b16.start.end [1/1] (short) (narrow) %v1245_v52, 16  ;;  %v806_v43 = vcombine.high %v782_v35, %v5968_v8  ;;  %v807_v44 = vcombine.high %v789_v37, %v5968_v8  ;;  %v5602_v56 = vpack.c.bf16 %v798_v32, %v782_v35 }
 0x382   : > { %1414 = vxpose.xlu0.c.b16.start.end [1/1] (short) (narrow) %v1313_v55, 16  ;;  %v5604_v51 = vpack.c.bf16 %v808_v38, %v806_v43 }
 0x384   : > { %1462 = vxpose.xlu1.c.b16.start.end [1/1] (short) (narrow) %v1254_v57, 16  ;;  %v5603_v57 = vpack.c.bf16 %v805_v33, %v789_v37 }
 0x386   : > { %1478 = vxpose.xlu0.c.b16.start.end [1/1] (short) (narrow) %v1322_v59, 16 }
 0x388   : > { %1526 = vxpose.xlu1.c.b16.start.end [1/1] (short) (narrow) %v1261_v61, 16 }
 0x38a   : > { %1542 = vxpose.xlu0.c.b16.start.end [1/1] (short) (narrow) %v1329_v62, 16 }
 0x38c   : > { %1366 = vxpose.xlu1.c.b16.start.end [1/1] (short) (narrow) %v1262_v0, 16 }
 0x38e   : > { %1382 = vxpose.xlu0.c.b16.start.end [1/1] (short) (narrow) %v1330_v1, 16 }
 0x390   : > { %1430 = vxpose.xlu1.c.b16.start.end [1/1] (short) (narrow) %v1263_v2, 16  ;;  %v1015_v2 = vrot.slane %v5604_v51, %v6140_v36 }
 0x392   : > { %1446 = vxpose.xlu0.c.b16.start.end [1/1] (short) (narrow) %v1331_v3, 16 }
 0x394   : > { %1494 = vxpose.xlu1.c.b16.start.end [1/1] (short) (narrow) %v1264_v4, 16 }
 0x396   : > { %1510 = vxpose.xlu0.c.b16.start.end [1/1] (short) (narrow) %v1332_v5, 16 }
 0x398   : > { %1558 = vxpose.xlu1.c.b16.start.end [1/1] (short) (narrow) %v1265_v6, 16 }
 0x39a   : > { %1574 = vxpose.xlu0.c.b16.start.end [1/1] (short) (narrow) %v1333_v7, 16 }
 0x39c   : > { %898 = vrot.lane.b32.xlu1 %v6130_v22, %s5975_s29  ;;  %v809_v22 = vcombine.high %v805_v33, %v5968_v8 }
 0x39e   : > { %v5605_v52 = vpack.c.bf16 %v809_v22, %v807_v44 }
 0x3a0   : > { %v1023_v3 = vrot.slane %v5605_v52, %v6140_v36 }
 0x3a2   : > { %v1024_v13 = vcombine.low %v1015_v2, %v1023_v3 }
 0x3a3   : > { %900 = vrot.lane.b32.xlu0 %v6136_v26, %s5975_s29 }
 0x3a4   : > { %v1031_v21 = vrot.slane %v1024_v13, %v6146_v42 }
 0x3a6   : > { %v1036_v30 = vshrl.u32 %v1031_v21, 16 }
 0x3de   : > { %v1342_v9 = vpop.trf.xlu1 }
 0x3e0   : > { %v1358_v10 = vpop.trf.xlu0 }
 0x3e2   : > { %v1406_v11 = vpop.trf.xlu1 }
 0x3e3   : > { %v1590_v45 = vcombine.low %v1342_v9, %v1406_v11  ;;  %v991_v9 = vrot.slane %v5602_v56, %v6140_v36 }
 0x3e4   : > { %v1422_v12 = vpop.trf.xlu0 }
 0x3e5   : > { %v1639_v47 = vcombine.low %v1358_v10, %v1422_v12  ;;  %v1597_v58 = vrot.slane %v1590_v45, %v6140_v36  ;;  %v999_v10 = vrot.slane %v5603_v57, %v6140_v36 }
 0x3e6   : > { %v1470_v14 = vpop.trf.xlu1 }
 0x3e7   : > { %v1646_v60 = vrot.slane %v1639_v47, %v6140_v36  ;;  %v1000_v17 = vcombine.low %v991_v9, %v999_v10  ;;  %v5601_v47 = vld [vmem:[%s6240_s24] ss:$0 sm:$0xff] }
 0x3e8   : > { %v1486_v16 = vpop.trf.xlu0 }
 0x3e9   : > { %v1007_v25 = vrot.slane %v1000_v17, %v6146_v42 }
 0x3ea   : > { %v1534_v19 = vpop.trf.xlu1 }
 0x3eb   : > { %v1606_v48 = vcombine.low %v1470_v14, %v1534_v19 }
 0x3ec   : > { %v1550_v23 = vpop.trf.xlu0 }
 0x3ed   : > { %v1655_v49 = vcombine.low %v1486_v16, %v1550_v23  ;;  %v1613_v61 = vrot.slane %v1606_v48, %v6140_v36 }
 0x3ee   : > { %v1374_v28 = vpop.trf.xlu1 }
 0x3ef   : > { %v1662_v1 = vrot.slane %v1655_v49, %v6140_v36 }
 0x3f0   : > { %v1390_v31 = vpop.trf.xlu0 }
 0x3f2   : > { %v1438_v34 = vpop.trf.xlu1 }
 0x3f3   : > { %v1598_v40 = vcombine.low %v1374_v28, %v1438_v34  ;;  %v1034_v28 = vpack.i.b16 %v1031_v21, %v1007_v25 }
 0x3f4   : > { %v1454_v26 = vpop.trf.xlu0 }
 0x3f5   : > { %v1647_v41 = vcombine.low %v1390_v31, %v1454_v26  ;;  %v1605_v53 = vrot.slane %v1598_v40, %v6140_v36  ;;  %v1035_v31 = vshrl.u32 %v1007_v25, 16 }
 0x3f6   : > { %v1502_v39 = vpop.trf.xlu1 }
 0x3f7   : > { %v1654_v54 = vrot.slane %v1647_v41, %v6140_v36  ;;  %v1622_v4 = vcombine.low %v1597_v58, %v1605_v53  ;;  %v1037_v32 = vpack.i.b16 %v1036_v30, %v1035_v31 }
 0x3f8   : > { %v1518_v46 = vpop.trf.xlu0 }
 0x3f9   : > { %v1671_v5 = vcombine.low %v1646_v60, %v1654_v54  ;;  %v1629_v14 = vrot.slane %v1622_v4, %v6146_v42 }
 0x3fa   : > { %v1566_v50 = vpop.trf.xlu1 }
 0x3fb   : > { %v1614_v55 = vcombine.low %v1502_v39, %v1566_v50  ;;  %v1678_v15 = vrot.slane %v1671_v5, %v6146_v42 }
 0x3fc   : > { %v1582_v59 = vpop.trf.xlu0 }
 0x3fd   : > { %v1621_v62 = vrot.slane %v1614_v55, %v6140_v36  ;;  %v1663_v0 = vcombine.low %v1518_v46, %v1582_v59 }
 0x3ff   : > { %v1630_v6 = vcombine.low %v1613_v61, %v1621_v62  ;;  %v1670_v7 = vrot.slane %v1663_v0, %v6140_v36 }
 0x401   : > { %v1679_v11 = vcombine.low %v1662_v1, %v1670_v7  ;;  %v1637_v12 = vrot.slane %v1630_v6, %v6146_v42 }
 0x403   : > { %v1686_v16 = vrot.slane %v1679_v11, %v6146_v42  ;;  %v1638_v19 = vcombine.low %v1629_v14, %v1637_v12 }
 0x405   : > { %v1687_v20 = vcombine.low %v1678_v15, %v1686_v16  ;;  %v1692_v27 = vshrl.u32 %v1638_v19, 16 }
 0x407   : > { %v1690_v23 = vpack.i.b16 %v1687_v20, %v1638_v19  ;;  %v1693_v24 = vshrl.u32 %v1687_v20, 16 }
 0x409   : > { %5759 = vmatpush3.bf16.msra.mxu1 %v1690_v23  ;;  %v1694_v29 = vpack.i.b16 %v1693_v24, %v1692_v27 }
 0x40a   : > { %5764 = vmatprep.subr.bf16.mxu1 %v5968_v8 }
 0x40c   : > { %5761 = vmatmul.mubr.msk.bf16.vlgmr.msra.gmra.mxu1 %vm1696_vm2, %v1034_v28 }
 0x40d   : > { %5765 = vmatpush3.bf16.msra.mxu1 %v1694_v29  ;;  %5766 = vmatprep.mubr.msk.bf16.mxu1 %vm5969_vm1, %v5968_v8 }
 0x40e   : > { %5776 = vmatprep.subr.bf16.mxu1 %v5968_v8  ;;  %v899_v33 = vpop.permute.xlu1 %898 }
 0x40f   : > { %v911_v35 = vrot.slane %v899_v33, %v6140_v36  ;;  %v904_v61 = vcombine.high %v899_v33, %v5968_v8 }
 0x411   : > { %v918_v0 = vrot.slane %v904_v61, %v6140_v36 }
 0x414   : > { %5767 = vmatmul.mubr.msk.bf16.vlgmr.msra.gmra.mxu1 %vm1696_vm2, %v1037_v32 }
 0x415   : > { %v901_v34 = vpop.permute.xlu0 %900  ;;  %5778 = vmatprep.mubr.msk.bf16.mxu1 %vm5969_vm1, %v5968_v8 }
 0x416   : > { %v926_v37 = vrot.slane %v901_v34, %v6140_v36  ;;  %v919_v60 = vcombine.high %v901_v34, %v5968_v8 }
 0x418   : > { %v934_v26 = vcombine.low %v911_v35, %v926_v37  ;;  %v935_v38 = vcombine.high %v911_v35, %v926_v37  ;;  %v933_v62 = vrot.slane %v919_v60, %v6140_v36 }
 0x41a   : > { %v942_v22 = vrot.slane %v934_v26, %v6146_v42  ;;  %v949_v39 = vrot.slane %v935_v38, %v6146_v42  ;;  %v950_v1 = vcombine.low %v918_v0, %v933_v62  ;;  %v951_v3 = vcombine.high %v918_v0, %v933_v62 }
 0x41c   : > { %v970_v40 = vpack.c.bf16 %v942_v22, %v942_v22  ;;  %v966_v41 = vcombine.high %v942_v22, %v5968_v8  ;;  %v967_v44 = vcombine.high %v949_v39, %v5968_v8  ;;  %v972_v45 = vpack.c.bf16 %v949_v39, %v949_v39 }
 0x41d   : > { %v958_v2 = vrot.slane %v950_v1, %v6146_v42  ;;  %v965_v5 = vrot.slane %v951_v3, %v6146_v42 }
 0x41e   : > { %1808 = vxpose.xlu1.c.b16.start.end [1/1] (short) (narrow) %v970_v40, 16  ;;  %v971_v43 = vpack.c.bf16 %v966_v41, %v966_v41  ;;  %v973_v46 = vpack.c.bf16 %v967_v44, %v967_v44 }
 0x41f   : > { %v974_v4 = vpack.c.bf16 %v958_v2, %v958_v2  ;;  %v976_v6 = vpack.c.bf16 %v965_v5, %v965_v5  ;;  %v968_v7 = vcombine.high %v958_v2, %v5968_v8  ;;  %v969_v10 = vcombine.high %v965_v5, %v5968_v8 }
 0x420   : > { %1824 = vxpose.xlu0.c.b16.start.end [1/1] (short) (narrow) %v971_v43, 16 }
 0x421   : > { %v975_v9 = vpack.c.bf16 %v968_v7, %v968_v7  ;;  %v977_v11 = vpack.c.bf16 %v969_v10, %v969_v10 }
 0x422   : > { %1840 = vxpose.xlu1.c.b16.start.end [1/1] (short) (narrow) %v972_v45, 16 }
 0x424   : > { %1856 = vxpose.xlu0.c.b16.start.end [1/1] (short) (narrow) %v973_v46, 16 }
 0x480   : > { %v1816_v12 = vpop.trf.xlu1 }
 0x481   : > { %v1940_v21 = vshrl.u32 %v1816_v12, 16 }
 0x482   : > { %v1832_v14 = vpop.trf.xlu0 }
 0x483   : > { %v1941_v23 = vshrl.u32 %v1832_v14, 16  ;;  %v1938_v29 = vpack.i.b16 %v1832_v14, %v1816_v12 }
 0x484   : > { %v1848_v13 = vpop.trf.xlu1 }
 0x485   : > { %v1948_v30 = vshrl.u32 %v1848_v13, 16  ;;  %v1942_v34 = vpack.i.b16 %v1941_v23, %v1940_v21 }
 0x486   : > { %v1864_v16 = vpop.trf.xlu0 }
 0x487   : > { %v1949_v31 = vshrl.u32 %v1864_v16, 16  ;;  %v1946_v37 = vpack.i.b16 %v1864_v16, %v1848_v13 }
 0x489   : > { %v1950_v39 = vpack.i.b16 %v1949_v31, %v1948_v30 }
 0x4cc   : > { %v1734_v48 = vpop.f32.mrf.mxu1 }
 0x4cd   : > { %v6243_v49 = vadd.f32 %v5601_v47, %v1734_v48 }
 0x4ce   : > { %v5762_v50 = vpop.f32.mrf.mxu1 }
 0x4cf   : > { %v1784_v51 = vsel %vm1783_vm3, %v6243_v49, -inf }
 0x4d0   : > { %1785 = vmax.xlane.f32.xlu1 %v1784_v51  ;;  %v1737_v52 = vpop.f32.mrf.mxu1 }
 0x4d2   : > { %v5763_v53 = vpop.f32.mrf.mxu1 }
 0x4d4   : > { %v1777_v54 = vpop.f32.mrf.mxu1 }
 0x4d5   : > { %v6247_v55 = vadd.f32 %v5601_v47, %v1777_v54 }
 0x4d6   : > { %v5768_v56 = vpop.f32.mrf.mxu1 }
 0x4d7   : > { %v1787_v57 = vsel %vm1783_vm3, %v6247_v55, -inf }
 0x4d8   : > { %1788 = vmax.xlane.f32.xlu0 %v1787_v57  ;;  %v1780_v58 = vpop.f32.mrf.mxu1 }
 0x4da   : > { %v5769_v59 = vpop.f32.mrf.mxu1 }
 0x4fd   : > { %1872 = vxpose.xlu1.c.b16.start.end [1/1] (short) (narrow) %v974_v4, 16 }
 0x501   : > { %1904 = vxpose.xlu1.c.b16.start.end [1/1] (short) (narrow) %v976_v6, 16 }
 0x505   : > { %1888 = vxpose.xlu0.c.b16.start.end [1/1] (short) (narrow) %v975_v9, 16 }
 0x509   : > { %1920 = vxpose.xlu0.c.b16.start.end [1/1] (short) (narrow) %v977_v11, 16 }
 0x559   : > { %v1786_v15 = vpop.xlane.xlu1 %1785 }
 0x55a   : > { %v1790_v2 = vsub.f32 %v6243_v49, %v1786_v15 }
 0x55c   : > { %v1792_v11 = vmul.f32 1.442695, %v1790_v2 }
 0x55e   : > { %5929 = vpow2.f32 %v1792_v11 }
 0x55f   : > { %v1880_v17 = vpop.trf.xlu1 }
 0x560   : > { %v1956_v20 = vshrl.u32 %v1880_v17, 16 }
 0x561   : > { %v1789_v19 = vpop.xlane.xlu0 %1788 }
 0x562   : > { %v1791_v6 = vsub.f32 %v6247_v55, %v1789_v19 }
 0x563   : > { %v1912_v25 = vpop.trf.xlu1 }
 0x564   : > { %v1964_v33 = vshrl.u32 %v1912_v25, 16  ;;  %v1794_v13 = vmul.f32 1.442695, %v1791_v6 }
 0x566   : > { %5931 = vpow2.f32 %v1794_v13 }
 0x567   : > { %v1896_v24 = vpop.trf.xlu0 }
 0x568   : > { %v1954_v27 = vpack.i.b16 %v1896_v24, %v1880_v17  ;;  %v1957_v28 = vshrl.u32 %v1896_v24, 16 }
 0x56a   : > { %v1958_v32 = vpack.i.b16 %v1957_v28, %v1956_v20  ;;  %v1968_v26 = vcombine.low %v1938_v29, %v1954_v27  ;;  %v1969_v58 = vcombine.high %v1938_v29, %v1954_v27 }
 0x56b   : > { %v1928_v35 = vpop.trf.xlu0  ;;  %v5930_v17 = vpop.eup %5929 }
 0x56c   : > { %v1962_v38 = vpack.i.b16 %v1928_v35, %v1912_v25  ;;  %v1965_v22 = vshrl.u32 %v1928_v35, 16  ;;  %v2036_v40 = vcombine.low %v1942_v34, %v1958_v32  ;;  %v1976_v45 = vrot.slane %v1968_v26, %v6140_v36 }
 0x56d   : > { %v2037_v62 = vcombine.high %v1942_v34, %v1958_v32  ;;  %v1983_v4 = vrot.slane %v1969_v58, %v6140_v36  ;;  %v1796_v20 = vsel %vm1783_vm3, %v5930_v17, 0.0 }
 0x56e   : > { %v1966_v41 = vpack.i.b16 %v1965_v22, %v1964_v33  ;;  %v1984_v43 = vcombine.low %v1946_v37, %v1962_v38  ;;  %v2044_v48 = vrot.slane %v2036_v40, %v6140_v36  ;;  %v1985_v54 = vcombine.high %v1946_v37, %v1962_v38 }
 0x56f   : > { %v2051_v10 = vrot.slane %v2037_v62, %v6140_v36 }
 0x570   : > { %v2052_v44 = vcombine.low %v1950_v39, %v1966_v41  ;;  %v1992_v46 = vrot.slane %v1984_v43, %v6140_v36  ;;  %v2053_v59 = vcombine.high %v1950_v39, %v1966_v41  ;;  %v1999_v1 = vrot.slane %v1985_v54, %v6140_v36 }
 0x572   : > { %v2000_v47 = vcombine.low %v1976_v45, %v1992_v46  ;;  %v2060_v50 = vrot.slane %v2052_v44, %v6140_v36  ;;  %v2001_v57 = vcombine.high %v1976_v45, %v1992_v46  ;;  %v2067_v5 = vrot.slane %v2053_v59, %v6140_v36 }
 0x573   : > { %v2016_v9 = vcombine.low %v1983_v4, %v1999_v1  ;;  %v5932_v19 = vpop.eup %5931  ;;  %v2017_v23 = vcombine.high %v1983_v4, %v1999_v1 }
 0x574   : > { %v2008_v51 = vrot.slane %v2000_v47, %v6146_v42  ;;  %v2068_v52 = vcombine.low %v2044_v48, %v2060_v50  ;;  %v2069_v61 = vcombine.high %v2044_v48, %v2060_v50  ;;  %v2015_v0 = vrot.slane %v2001_v57, %v6146_v42 }
 0x575   : > { %v2084_v49 = vcombine.low %v2051_v10, %v2067_v5  ;;  %v2024_v14 = vrot.slane %v2016_v9, %v6146_v42  ;;  %v1799_v21 = vsel %vm1783_vm3, %v5932_v19, 0.0  ;;  %v2085_v24 = vcombine.high %v2051_v10, %v2067_v5 }
 0x576   : > { %2104 = vxpose.xlu1.c.b16.start.end [1/1] (short) (narrow) %v2008_v51, 16  ;;  %v2076_v53 = vrot.slane %v2068_v52, %v6146_v42  ;;  %v2032_v56 = vcombine.high %v2008_v51, %v5974_v63  ;;  %v2083_v3 = vrot.slane %v2069_v61, %v6146_v42  ;;  %v2033_v7 = vcombine.high %v2015_v0, %v5974_v63 }
 0x577   : > { %v2092_v15 = vrot.slane %v2084_v49, %v6146_v42  ;;  %v2034_v55 = vcombine.high %v2024_v14, %v5974_v63  ;;  %v2031_v25 = vrot.slane %v2017_v23, %v6146_v42  ;;  %v2099_v27 = vrot.slane %v2085_v24, %v6146_v42 }
 0x578   : > { %2120 = vxpose.xlu0.c.b16.start.end [1/1] (short) (narrow) %v2076_v53, 16  ;;  %v2100_v60 = vcombine.high %v2076_v53, %v5974_v63  ;;  %v2101_v12 = vcombine.high %v2083_v3, %v5974_v63 }
 0x579   : > { %v2102_v16 = vcombine.high %v2092_v15, %v5974_v63  ;;  %v2035_v28 = vcombine.high %v2031_v25, %v5974_v63  ;;  %v2103_v29 = vcombine.high %v2099_v27, %v5974_v63 }
 0x57a   : > { %2136 = vxpose.xlu1.c.b16.start.end [1/1] (short) (narrow) %v2032_v56, 16 }
 0x57c   : > { %2152 = vxpose.xlu0.c.b16.start.end [1/1] (short) (narrow) %v2100_v60, 16 }
 0x57e   : > { %2168 = vxpose.xlu1.c.b16.start.end [1/1] (short) (narrow) %v2015_v0, 16 }
 0x580   : > { %2184 = vxpose.xlu0.c.b16.start.end [1/1] (short) (narrow) %v2083_v3, 16 }
 0x582   : > { %2200 = vxpose.xlu1.c.b16.start.end [1/1] (short) (narrow) %v2033_v7, 16 }
 0x584   : > { %2216 = vxpose.xlu0.c.b16.start.end [1/1] (short) (narrow) %v2101_v12, 16 }
 0x586   : > { %2232 = vxpose.xlu1.c.b16.start.end [1/1] (short) (narrow) %v2024_v14, 16 }
 0x588   : > { %2248 = vxpose.xlu0.c.b16.start.end [1/1] (short) (narrow) %v2092_v15, 16 }
 0x58a   : > { %2264 = vxpose.xlu1.c.b16.start.end [1/1] (short) (narrow) %v2034_v55, 16 }
 0x58c   : > { %2280 = vxpose.xlu0.c.b16.start.end [1/1] (short) (narrow) %v2102_v16, 16 }
 0x597   : > { %1797 = vadd.xlane.f32.xlu1 %v1796_v20 }
 0x599   : > { %1800 = vadd.xlane.f32.xlu0 %v1799_v21 }
 0x5c4   : > { %2296 = vxpose.xlu1.c.b16.start.end [1/1] (short) (narrow) %v2031_v25, 16 }
 0x5c6   : > { %2312 = vxpose.xlu0.c.b16.start.end [1/1] (short) (narrow) %v2099_v27, 16 }
 0x5c8   : > { %2328 = vxpose.xlu1.c.b16.start.end [1/1] (short) (narrow) %v2035_v28, 16 }
 0x5ca   : > { %2344 = vxpose.xlu0.c.b16.start.end [1/1] (short) (narrow) %v2103_v29, 16 }
 0x5d8   : > { %v2112_v30 = vpop.trf.xlu1 }
 0x5da   : > { %v2128_v31 = vpop.trf.xlu0 }
 0x5dc   : > { %v2144_v32 = vpop.trf.xlu1 }
 0x5de   : > { %v2160_v33 = vpop.trf.xlu0 }
 0x5e0   : > { %v2176_v34 = vpop.trf.xlu1 }
 0x5e1   : > { %v2360_v45 = vcombine.low %v2112_v30, %v2176_v34 }
 0x5e2   : > { %v2192_v35 = vpop.trf.xlu0 }
 0x5e3   : > { %v2409_v44 = vcombine.low %v2128_v31, %v2192_v35  ;;  %v2367_v53 = vrot.slane %v2360_v45, %v6140_v36  ;;  %v5905_v35 = vld [vmem:[%s6702_s6 + $0x8] sm:$0xff]  }
 0x5e4   : > { %v2208_v37 = vpop.trf.xlu1 }
 0x5e5   : > { %v2368_v47 = vcombine.low %v2144_v32, %v2208_v37  ;;  %v2416_v52 = vrot.slane %v2409_v44, %v6140_v36 }
 0x5e6   : > { %v2224_v26 = vpop.trf.xlu0 }
 0x5e7   : > { %v2417_v46 = vcombine.low %v2160_v33, %v2224_v26  ;;  %v2375_v56 = vrot.slane %v2368_v47, %v6140_v36 }
 0x5e8   : > { %v2240_v38 = vpop.trf.xlu1 }
 0x5e9   : > { %v2424_v54 = vrot.slane %v2417_v46, %v6140_v36  ;;  %v2392_v3 = vcombine.low %v2367_v53, %v2375_v56  ;;  %v5906_v56 = vld [vmem:[%s6702_s6] sm:$0xff]  }
 0x5ea   : > { %v2256_v22 = vpop.trf.xlu0 }
 0x5eb   : > { %v2441_v2 = vcombine.low %v2416_v52, %v2424_v54  ;;  %v2399_v13 = vrot.slane %v2392_v3, %v6146_v42 }
 0x5ec   : > { %v2272_v39 = vpop.trf.xlu1 }
 0x5ed   : > { %v2448_v14 = vrot.slane %v2441_v2, %v6146_v42 }
 0x5ee   : > { %v2288_v40 = vpop.trf.xlu0 }
 0x620   : > { %v1798_v41 = vpop.xlane.xlu1 %1797 }
 0x621   : > { %5933 = vrcp.f32 %v1798_v41 }
 0x622   : > { %v1801_v43 = vpop.xlane.xlu0 %1800 }
 0x623   : > { %5935 = vrcp.f32 %v1801_v43 }
 0x626   : > { %v2304_v48 = vpop.trf.xlu1 }
 0x627   : > { %v2376_v51 = vcombine.low %v2240_v38, %v2304_v48 }
 0x628   : > { %v2320_v50 = vpop.trf.xlu0 }
 0x629   : > { %v2425_v58 = vcombine.low %v2256_v22, %v2320_v50  ;;  %v2383_v61 = vrot.slane %v2376_v51, %v6140_v36 }
 0x62a   : > { %v2336_v57 = vpop.trf.xlu1 }
 0x62b   : > { %v2384_v59 = vcombine.low %v2272_v39, %v2336_v57  ;;  %v2432_v4 = vrot.slane %v2425_v58, %v6140_v36 }
 0x62c   : > { %v2352_v60 = vpop.trf.xlu0 }
 0x62d   : > { %v2391_v62 = vrot.slane %v2384_v59, %v6140_v36  ;;  %v2433_v0 = vcombine.low %v2288_v40, %v2352_v60 }
 0x62e   : > { %v5934_v1 = vpop.eup %5933 }
 0x62f   : > { %v2400_v5 = vcombine.low %v2383_v61, %v2391_v62  ;;  %v2440_v6 = vrot.slane %v2433_v0, %v6140_v36  ;;  %v1804_v7 = vmul.f32 %v5934_v1, %v5930_v17 }
 0x630   : > { %v5936_v9 = vpop.eup %5935 }
 0x631   : > { %v2407_v10 = vrot.slane %v2400_v5, %v6146_v42  ;;  %v2449_v11 = vcombine.low %v2432_v4, %v2440_v6  ;;  %v1806_v12 = vpack.c.bf16 %v1804_v7, %v1804_v7  ;;  %v1805_v49 = vmul.f32 %v5936_v9, %v5932_v19 }
 0x633   : > { %v2456_v15 = vrot.slane %v2449_v11, %v6146_v42  ;;  %v2468_v55 = vsel %vm1783_vm3, %v1806_v12, 0  ;;  %v1807_v16 = vpack.c.bf16 %v1805_v49, %v1805_v49  ;;  %v2408_v20 = vcombine.low %v2399_v13, %v2407_v10  ;;  %v5612_v10 = vld [vmem:[%s6703_s7] ss:$0 sm:$0xff] }
 0x634   : > { %5771 = vmatpush3.bf16.xpose.msra.mxu0 %v2468_v55 }
 0x635   : > { %v2457_v21 = vcombine.low %v2448_v14, %v2456_v15  ;;  %v2515_v17 = vsel %vm1783_vm3, %v1807_v16, 0  ;;  %5782 = vmatprep.subr.bf16.mxu0 %v5968_v8  ;;  %v2461_v19 = vshrl.u32 %v2408_v20, 16 }
 0x636   : > { %5777 = vmatpush3.bf16.xpose.msra.mxu1 %v2515_v17 }
 0x637   : > { %v2462_v23 = vshrl.u32 %v2457_v21, 16  ;;  %5790 = vmatprep.subr.bf16.mxu1 %v5968_v8  ;;  %v2460_v24 = vpack.i.b16 %v2457_v21, %v2408_v20 }
 0x639   : > { %v2463_v25 = vpack.i.b16 %v2462_v23, %v2461_v19  ;;  %v5907_v19 = vld [vmem:[%s6706_s10 + $0x8] sm:$0xff]  }
 0x63b   : > { %5773 = vmatmul.mubr.msk.bf16.vlgmr.msra.gmra.mxu0 %vm1783_vm3, %v2460_v24 }
 0x63c   : > { %5786 = vmatprep.mubr.msk.bf16.mxu0 %vm5969_vm1, %v5968_v8  ;;  %5783 = vmatpush3.bf16.msra.mxu0 %v5905_v35  ;;  %v5909_v35 = vld [vmem:[%s6708_s12 + $0x18] sm:$0xff]  }
 0x63d   : > { %5779 = vmatmul.mubr.msk.bf16.vlgmr.msra.gmra.mxu1 %vm1783_vm3, %v2463_v25  ;;  %5784 = vmatprep.subr.bf16.mxu0 %v5968_v8 }
 0x63e   : > { %5794 = vmatprep.mubr.msk.bf16.mxu1 %vm5969_vm1, %v5968_v8  ;;  %5791 = vmatpush3.bf16.msra.mxu1 %v5907_v19 }
 0x63f   : > { %5792 = vmatprep.subr.bf16.mxu1 %v5968_v8 }
 0x640   : > { %5785 = vmatpush3.bf16.msra.mxu0 %v5906_v56 }
 0x641   : > { %5798 = vmatprep.subr.bf16.mxu0 %v5968_v8 }
 0x6fb   : > { %v2504_v27 = vpop.f32.mrf.mxu0 }
 0x6fc   : > { %2558 = vxpose.xlu1.b32.start [1/2] (short) (narrow) %v2504_v27, 8 }
 0x6fd   : > { %v5774_v28 = vpop.f32.mrf.mxu0  ;;  %v2551_v29 = vpop.f32.mrf.mxu1 }
 0x6fe   : > { %2590 = vxpose.xlu0.b32.start [1/2] (short) (narrow) %v2551_v29, 8  ;;  %v5616_v29 = vld [vmem:[%s6704_s8] ss:$0 sm:$0xff] }
 0x6ff   : > { %v2507_v30 = vpop.f32.mrf.mxu0  ;;  %v5780_v31 = vpop.f32.mrf.mxu1 }
 0x700   : > { %2559 = vxpose.xlu1.b32.end [2/2] (short) (narrow) %v2507_v30, 8  ;;  %v5617_v31 = vld [vmem:[%s6705_s9] ss:$0 sm:$0xff] }
 0x701   : > { %v5775_v32 = vpop.f32.mrf.mxu0  ;;  %v2554_v33 = vpop.f32.mrf.mxu1 }
 0x702   : > { %2591 = vxpose.xlu0.b32.end [2/2] (short) (narrow) %v2554_v33, 8 }
 0x703   : > { %v5781_v34 = vpop.f32.mrf.mxu1 }
 0x778   : > { %v2574_v37 = vpop.trf.xlu1 }
 0x779   : > { %v2622_v26 = vcombine.high %v2574_v37, %v5968_v8  ;;  %v2629_v38 = vrot.slane %v2574_v37, %v6140_v36  ;;  %v5910_v37 = vld [vmem:[%s6708_s12 + $0x10] sm:$0xff]  }
 0x77a   : > { %v2606_v22 = vpop.trf.xlu0 }
 0x77b   : > { %v2637_v39 = vcombine.high %v2606_v22, %v5968_v8  ;;  %v2644_v40 = vrot.slane %v2606_v22, %v6140_v36  ;;  %v2636_v41 = vrot.slane %v2622_v26, %v6140_v36  ;;  %v5911_v26 = vld [vmem:[%s6708_s12 + $0x8] sm:$0xff]   ;;  %v5618_v22 = vld [vmem:[%s6707_s11] ss:$0 sm:$0xff] }
 0x77d   : > { %v2651_v43 = vrot.slane %v2637_v39, %v6140_v36  ;;  %v2652_v44 = vcombine.low %v2629_v38, %v2644_v40  ;;  %v2653_v45 = vcombine.high %v2629_v38, %v2644_v40  ;;  %v5912_v38 = vld [vmem:[%s6708_s12] sm:$0xff]  }
 0x77f   : > { %v2660_v46 = vrot.slane %v2652_v44, %v6146_v42  ;;  %v2667_v47 = vrot.slane %v2653_v45, %v6146_v42  ;;  %v2668_v48 = vcombine.low %v2636_v41, %v2651_v43  ;;  %v2669_v50 = vcombine.high %v2636_v41, %v2651_v43 }
 0x781   : > { %v2676_v51 = vrot.slane %v2668_v48, %v6146_v42  ;;  %v2683_v52 = vrot.slane %v2669_v50, %v6146_v42  ;;  %v2688_v53 = vcombine.low %v2660_v46, %v2667_v47  ;;  %v5610_v54 = vcombine.high %v2660_v46, %v2667_v47 }
 0x783   : > { %v2695_v57 = vrot.slane %v2688_v53, %v6140_v36  ;;  %v2703_v58 = vrot.slane %v5610_v54, %v6140_v36  ;;  %v2704_v59 = vcombine.low %v2676_v51, %v2683_v52  ;;  %v5611_v60 = vcombine.high %v2676_v51, %v2683_v52 }
 0x785   : > { %v2711_v61 = vrot.slane %v2704_v59, %v6140_v36  ;;  %v2719_v62 = vrot.slane %v5611_v60, %v6140_v36  ;;  %v2720_v0 = vcombine.low %v2695_v57, %v2703_v58  ;;  %v5622_v57 = vld [vmem:[%s6709_s13] ss:$0 sm:$0xff] }
 0x787   : > { %v2728_v1 = vcombine.low %v2711_v61, %v2719_v62  ;;  %v2727_v2 = vrot.slane %v2720_v0, %v6146_v42 }
 0x789   : > { %v2735_v3 = vrot.slane %v2728_v1, %v6146_v42 }
 0x78b   : > { %v2737_v4 = vcombine.high %v2727_v2, %v2735_v3  ;;  %v2736_v5 = vcombine.low %v2727_v2, %v2735_v3 }
 0x78d   : > { %2739 = vrot.lane.b32.xlu0 %v2737_v4, %s6719_s30 }
 0x7ff   : > { %v2740_v6 = vpop.permute.xlu0 %2739 }
 0x800   : > { %v2742_v7 = vsel %vm1696_vm2, %v2736_v5, %v2740_v6 }
 0x801   : > { %v2743_v9 = vpack.c.bf16 %v2742_v7, %v2742_v7  ;;  %v5913_v7 = vld [vmem:[%s6726_s28 + $0x18] sm:$0xff]  }
 0x803   : > { %5787 = vmatmul.mubr.msk.bf16.vlgmr.msra.gmra.mxu0 %vm643_vm0, %v2743_v9  ;;  %v5914_v9 = vld [vmem:[%s6726_s28 + $0x10] sm:$0xff]  }
 0x804   : > { %5806 = vmatprep.mubr.msk.bf16.mxu0 %vm5969_vm1, %v5968_v8  ;;  %5799 = vmatpush3.bf16.msra.mxu0 %v5909_v35 }
 0x805   : > { %5800 = vmatprep.subr.bf16.mxu0 %v5968_v8 }
 0x808   : > { %5801 = vmatpush3.bf16.msra.mxu0 %v5910_v37 }
 0x809   : > { %5802 = vmatprep.subr.bf16.mxu0 %v5968_v8 }
 0x80c   : > { %5803 = vmatpush3.bf16.msra.mxu0 %v5911_v26 }
 0x80d   : > { %5804 = vmatprep.subr.bf16.mxu0 %v5968_v8 }
 0x810   : > { %5805 = vmatpush3.bf16.msra.mxu0 %v5912_v38 }
 0x811   : > { %5824 = vmatprep.subr.bf16.mxu0 %v5968_v8 }
 0x8c3   : > { %v2804_v11 = vpop.f32.mrf.mxu0 }
 0x8c4   : > { %v2805_v12 = vadd.f32 %v5612_v10, %v2804_v11 }
 0x8c5   : > { %v5788_v49 = vpop.f32.mrf.mxu0 }
 0x8c6   : > { %v2810_v13 = vadd.f32 %v2805_v12, %v6120_v18  ;;  %v5908_v18 = vld [vmem:[%s6706_s10] sm:$0xff]  }
 0x8c7   : > { %v2807_v14 = vpop.f32.mrf.mxu0  ;;  %5793 = vmatpush3.bf16.msra.mxu1 %v5908_v18 }
 0x8c8   : > { %v2813_v15 = vsel %vm643_vm0, %v2810_v13, 0.0  ;;  %5810 = vmatprep.subr.bf16.mxu1 %v5968_v8 }
 0x8c9   : > { %2814 = vadd.xlane.f32.xlu1 %v2813_v15  ;;  %v5789_v55 = vpop.f32.mrf.mxu0  ;;  %v5629_v15 = vld [vmem:[%s6711_s15] ss:$0 sm:$0xff] }
 0x952   : > { %v2815_v16 = vpop.xlane.xlu1 %2814 }
 0x953   : > { %v2816_v20 = vmul.f32 0.03125, %v2815_v16 }
 0x955   : > { %v2817_v21 = vsub.f32 %v2810_v13, %v2816_v20  ;;  %v5628_v13 = vld [vmem:[%s6710_s14] ss:$0 sm:$0xff] }
 0x957   : > { %v2818_v17 = vmul.f32 %v2817_v21, %v2817_v21 }
 0x959   : > { %v2819_v23 = vsel %vm643_vm0, %v2818_v17, 0.0 }
 0x95a   : > { %2820 = vadd.xlane.f32.xlu0 %v2819_v23 }
 0x9e3   : > { %v2821_v24 = vpop.xlane.xlu0 %2820 }
 0x9e4   : > { %v2822_v25 = vmul.f32 0.03125, %v2821_v24 }
 0x9e6   : > { %v2823_v27 = vadd.f32 1e-12, %v2822_v25 }
 0x9e8   : > { %5937 = vrsqrt.f32 %v2823_v27 }
 0x9f5   : > { %v5938_v28 = vpop.eup %5937 }
 0x9f6   : > { %v2825_v30 = vmul.f32 %v5938_v28, %v2817_v21  ;;  %v5635_v21 = vld [vmem:[%s6701_s5 + $0x1] ss:$0 sm:$0xff] }
 0x9f8   : > { %v2832_v32 = vmul.f32 %v5616_v29, %v2825_v30 }
 0x9fa   : > { %v2839_v33 = vadd.f32 %v5617_v31, %v2832_v32 }
 0x9fc   : > { %v2840_v34 = vpack.c.bf16 %v2839_v33, %v2839_v33 }
 0x9fe   : > { %5795 = vmatmul.mubr.msk.bf16.vlgmr.msra.gmra.mxu1 %vm643_vm0, %v2840_v34 }
 0x9ff   : > { %5814 = vmatprep.mubr.msk.bf16.mxu1 %vm5969_vm1, %v5968_v8  ;;  %5811 = vmatpush3.bf16.msra.mxu1 %v5913_v7 }
 0xa00   : > { %5812 = vmatprep.subr.bf16.mxu1 %v5968_v8 }
 0xa03   : > { %5813 = vmatpush3.bf16.msra.mxu1 %v5914_v9 }
 0xa04   : > { %5818 = vmatprep.subr.bf16.mxu1 %v5968_v8 }
 0xabe   : > { %v2901_v39 = vpop.f32.mrf.mxu1 }
 0xabf   : > { %v2902_v40 = vadd.f32 %v5618_v22, %v2901_v39 }
 0xac0   : > { %v5796_v41 = vpop.f32.mrf.mxu1 }
 0xac1   : > { %v2908_v43 = vmul.f32 0.044715, %v2902_v40  ;;  %v2907_v52 = vmul.f32 0.5, %v2902_v40 }
 0xac2   : > { %v2904_v44 = vpop.f32.mrf.mxu1 }
 0xac3   : > { %v2909_v45 = vmul.f32 %v2908_v43, %v2902_v40 }
 0xac4   : > { %v5797_v46 = vpop.f32.mrf.mxu1 }
 0xac5   : > { %v2910_v47 = vmul.f32 %v2909_v45, %v2902_v40 }
 0xac7   : > { %v2911_v48 = vadd.f32 %v2910_v47, %v2902_v40 }
 0xac9   : > { %v2912_v50 = vmul.f32 0.7978846, %v2911_v48 }
 0xacb   : > { %5939 = vtanh.f32 %v2912_v50 }
 0xad8   : > { %v5940_v51 = vpop.eup %5939 }
 0xad9   : > { %v2914_v53 = vadd.f32 1.0, %v5940_v51 }
 0xadb   : > { %v2915_v54 = vmul.f32 %v2914_v53, %v2907_v52 }
 0xadd   : > { %v2916_v56 = vpack.c.bf16 %v2915_v54, %v2915_v54 }
 0xadf   : > { %5807 = vmatmul.mubr.msk.bf16.vlgmr.msra.gmra.mxu0 %vm2956_vm4, %v2916_v56 }
 0xae0   : > { %5826 = vmatprep.mubr.msk.bf16.mxu0 %vm5969_vm1, %v5968_v8 }
 0xb9f   : > { %v2994_v58 = vpop.f32.mrf.mxu0 }
 0xba0   : > { %v2995_v59 = vadd.f32 %v5622_v57, %v2994_v58 }
 0xba1   : > { %v5808_v60 = vpop.f32.mrf.mxu0 }
 0xba2   : > { %v3000_v61 = vadd.f32 %v2995_v59, %v2839_v33 }
 0xba3   : > { %v2997_v62 = vpop.f32.mrf.mxu0 }
 0xba4   : > { %v3003_v0 = vsel %vm643_vm0, %v3000_v61, 0.0 }
 0xba5   : > { %3004 = vadd.xlane.f32.xlu1 %v3003_v0  ;;  %v5809_v1 = vpop.f32.mrf.mxu0 }
 0xc2e   : > { %v3005_v2 = vpop.xlane.xlu1 %3004 }
 0xc2f   : > { %v3006_v3 = vmul.f32 0.03125, %v3005_v2 }
 0xc31   : > { %v3007_v4 = vsub.f32 %v3000_v61, %v3006_v3 }
 0xc33   : > { %v3008_v5 = vmul.f32 %v3007_v4, %v3007_v4 }
 0xc35   : > { %v3009_v6 = vsel %vm643_vm0, %v3008_v5, 0.0 }
 0xc36   : > { %3010 = vadd.xlane.f32.xlu1 %v3009_v6 }
 0xcbf   : > { %v3011_v10 = vpop.xlane.xlu1 %3010 }
 0xcc0   : > { %v3012_v11 = vmul.f32 0.03125, %v3011_v10 }
 0xcc2   : > { %v3013_v12 = vadd.f32 1e-12, %v3012_v11 }
 0xcc4   : > { %5941 = vrsqrt.f32 %v3013_v12 }
 0xcd1   : > { %v5942_v49 = vpop.eup %5941 }
 0xcd2   : > { %v3015_v14 = vmul.f32 %v5942_v49, %v3007_v4 }
 0xcd4   : > { %v3022_v55 = vmul.f32 %v5628_v13, %v3015_v14 }
 0xcd6   : > { %v6402_v16 = vadd.f32 %v5629_v15, %v3022_v55 }
 0xcd8   : > { %v3030_v20 = vpack.c.bf16 %v6402_v16, %v6402_v16 }
 0xcda   : > { %5815 = vmatmul.mubr.msk.bf16.vlgmr.msra.gmra.mxu1 %vm643_vm0, %v3030_v20 }
 0xcdb   : > { %5820 = vmatprep.mubr.msk.bf16.mxu1 %vm5969_vm1, %v5968_v8 }
 0xd9a   : > { %v3093_v17 = vpop.f32.mrf.mxu1 }
 0xd9b   : > { %v6412_v23 = vadd.f32 %v5635_v21, %v3093_v17 }
 0xd9c   : > { %v5816_v19 = vpop.f32.mrf.mxu1 }
 0xd9d   : > { %3100 = vrot.lane.b32.xlu1 %v6412_v23, %s5970_s27 }
 0xd9e   : > { %v3096_v18 = vpop.f32.mrf.mxu1 }
 0xda0   : > { %v5817_v24 = vpop.f32.mrf.mxu1 }
 0xda1   : > { %3177 = vrot.lane.b32.xlu1 %v6412_v23, %s5971_s4 }
 0xe0f   : > { %v6418_v25 = vpop.permute.xlu1 %3100 }
 0xe10   : > { %3179 = vrot.lane.b32.xlu0 %v6418_v25, %s5971_s4 }
 0xe13   : > { %v3178_v27 = vpop.permute.xlu1 %3177 }
 0xe14   : > { %v3183_v28 = vcombine.high %v3178_v27, %v5968_v8  ;;  %v3190_v30 = vrot.slane %v3178_v27, %v6140_v36 }
 0xe16   : > { %v3197_v33 = vrot.slane %v3183_v28, %v6140_v36 }
 0xe82   : > { %v3180_v29 = vpop.permute.xlu0 %3179 }
 0xe83   : > { %v3198_v31 = vcombine.high %v3180_v29, %v5968_v8  ;;  %v3205_v32 = vrot.slane %v3180_v29, %v6140_v36 }
 0xe85   : > { %v3212_v34 = vrot.slane %v3198_v31, %v6140_v36  ;;  %v3213_v35 = vcombine.low %v3190_v30, %v3205_v32  ;;  %v3214_v37 = vcombine.high %v3190_v30, %v3205_v32 }
 0xe87   : > { %v3221_v26 = vrot.slane %v3213_v35, %v6146_v42  ;;  %v3230_v38 = vcombine.high %v3197_v33, %v3212_v34  ;;  %v3228_v40 = vrot.slane %v3214_v37, %v6146_v42  ;;  %v3229_v46 = vcombine.low %v3197_v33, %v3212_v34 }
 0xe89   : > { %v3249_v22 = vpack.c.bf16 %v3221_v26, %v3221_v26  ;;  %v3245_v39 = vcombine.high %v3221_v26, %v5968_v8  ;;  %v3244_v43 = vrot.slane %v3230_v38, %v6146_v42  ;;  %v3251_v44 = vpack.c.bf16 %v3228_v40, %v3228_v40 }
 0xe8a   : > { %v3246_v45 = vcombine.high %v3228_v40, %v5968_v8  ;;  %v3237_v50 = vrot.slane %v3229_v46, %v6146_v42 }
 0xe8b   : > { %3391 = vxpose.xlu1.c.b16.start.end [1/1] (short) (narrow) %v3249_v22, 16  ;;  %v3250_v41 = vpack.c.bf16 %v3245_v39, %v3245_v39  ;;  %v3255_v47 = vpack.c.bf16 %v3244_v43, %v3244_v43  ;;  %v3248_v54 = vcombine.high %v3244_v43, %v5968_v8 }
 0xe8c   : > { %v3252_v48 = vpack.c.bf16 %v3246_v45, %v3246_v45  ;;  %v3253_v51 = vpack.c.bf16 %v3237_v50, %v3237_v50  ;;  %v3247_v52 = vcombine.high %v3237_v50, %v5968_v8 }
 0xe8d   : > { %3407 = vxpose.xlu0.c.b16.start.end [1/1] (short) (narrow) %v3250_v41, 16  ;;  %v3256_v56 = vpack.c.bf16 %v3248_v54, %v3248_v54 }
 0xe8e   : > { %v3254_v53 = vpack.c.bf16 %v3247_v52, %v3247_v52 }
 0xe8f   : > { %3423 = vxpose.xlu1.c.b16.start.end [1/1] (short) (narrow) %v3251_v44, 16 }
 0xe91   : > { %3487 = vxpose.xlu0.c.b16.start.end [1/1] (short) (narrow) %v3255_v47, 16 }
 0xe93   : > { %3439 = vxpose.xlu1.c.b16.start.end [1/1] (short) (narrow) %v3252_v48, 16 }
 0xe97   : > { %3455 = vxpose.xlu1.c.b16.start.end [1/1] (short) (narrow) %v3253_v51, 16 }
 0xe9b   : > { %3471 = vxpose.xlu1.c.b16.start.end [1/1] (short) (narrow) %v3254_v53, 16 }
 0xe9f   : > { %3503 = vxpose.xlu1.c.b16.start.end [1/1] (short) (narrow) %v3256_v56, 16 }
 0xeed   : > { %v3399_v57 = vpop.trf.xlu1 }
 0xeee   : > { %v3523_v5 = vshrl.u32 %v3399_v57, 16 }
 0xeef   : > { %v3415_v60 = vpop.trf.xlu0 }
 0xef0   : > { %v3524_v62 = vshrl.u32 %v3415_v60, 16  ;;  %v3521_v6 = vpack.i.b16 %v3415_v60, %v3399_v57 }
 0xef1   : > { %v3431_v58 = vpop.trf.xlu1 }
 0xef2   : > { %v3525_v11 = vpack.i.b16 %v3524_v62, %v3523_v5  ;;  %v3531_v12 = vshrl.u32 %v3431_v58, 16 }
 0xef3   : > { %v3495_v1 = vpop.trf.xlu0 }
 0xef4   : > { %v3547_v10 = vshrl.u32 %v3495_v1, 16 }
 0xef5   : > { %v3447_v59 = vpop.trf.xlu1 }
 0xef6   : > { %v3532_v7 = vshrl.u32 %v3447_v59, 16  ;;  %v3529_v13 = vpack.i.b16 %v3447_v59, %v3431_v58 }
 0xef8   : > { %v3533_v20 = vpack.i.b16 %v3532_v7, %v3531_v12  ;;  %v3125_v12 = vrot.slane %v6418_v25, %v6140_v36 }
 0xef9   : > { %v3463_v61 = vpop.trf.xlu1 }
 0xefa   : > { %v3539_v2 = vshrl.u32 %v3463_v61, 16 }
 0xefd   : > { %v3479_v0 = vpop.trf.xlu1 }
 0xefe   : > { %v3537_v3 = vpack.i.b16 %v3479_v0, %v3463_v61  ;;  %v3540_v4 = vshrl.u32 %v3479_v0, 16 }
 0xf00   : > { %v3541_v9 = vpack.i.b16 %v3540_v4, %v3539_v2  ;;  %v3551_v14 = vcombine.low %v3521_v6, %v3537_v3  ;;  %v3552_v29 = vcombine.high %v3521_v6, %v3537_v3  ;;  %v3118_v4 = vcombine.high %v6418_v25, %v5968_v8 }
 0xf01   : > { %v3511_v49 = vpop.trf.xlu1  ;;  %v3103_v6 = vcombine.high %v6412_v23, %v5968_v8 }
 0xf02   : > { %v3545_v15 = vpack.i.b16 %v3511_v49, %v3495_v1  ;;  %v3548_v55 = vshrl.u32 %v3511_v49, 16  ;;  %v3619_v21 = vcombine.low %v3525_v11, %v3541_v9  ;;  %v3559_v27 = vrot.slane %v3551_v14, %v6140_v36 }
 0xf03   : > { %v3620_v34 = vcombine.high %v3525_v11, %v3541_v9  ;;  %v3566_v40 = vrot.slane %v3552_v29, %v6140_v36  ;;  %v3132_v9 = vrot.slane %v3118_v4, %v6140_v36  ;;  %v3117_v11 = vrot.slane %v3103_v6, %v6140_v36 }
 0xf04   : > { %v3549_v17 = vpack.i.b16 %v3548_v55, %v3547_v10  ;;  %v3567_v19 = vcombine.low %v3529_v13, %v3545_v15  ;;  %v3568_v18 = vcombine.high %v3529_v13, %v3545_v15  ;;  %v3627_v32 = vrot.slane %v3619_v21, %v6140_v36 }
 0xf05   : > { %v3634_v45 = vrot.slane %v3620_v34, %v6140_v36  ;;  %v3110_v13 = vrot.slane %v6412_v23, %v6140_v36  ;;  %v3149_v14 = vcombine.low %v3117_v11, %v3132_v9  ;;  %v3150_v15 = vcombine.high %v3117_v11, %v3132_v9 }
 0xf06   : > { %v3635_v24 = vcombine.low %v3533_v20, %v3549_v17  ;;  %v3575_v28 = vrot.slane %v3567_v19, %v6140_v36  ;;  %v3636_v30 = vcombine.high %v3533_v20, %v3549_v17  ;;  %v3582_v38 = vrot.slane %v3568_v18, %v6140_v36 }
 0xf07   : > { %v3133_v20 = vcombine.low %v3110_v13, %v3125_v12  ;;  %v3134_v21 = vcombine.high %v3110_v13, %v3125_v12  ;;  %v3157_v19 = vrot.slane %v3149_v14, %v6146_v42  ;;  %v3164_v18 = vrot.slane %v3150_v15, %v6146_v42 }
 0xf08   : > { %v3583_v31 = vcombine.low %v3559_v27, %v3575_v28  ;;  %v3643_v33 = vrot.slane %v3635_v24, %v6140_v36  ;;  %v3584_v26 = vcombine.high %v3559_v27, %v3575_v28  ;;  %v3650_v41 = vrot.slane %v3636_v30, %v6140_v36 }
 0xf09   : > { %v3599_v44 = vcombine.low %v3566_v40, %v3582_v38  ;;  %v3600_v50 = vcombine.high %v3566_v40, %v3582_v38  ;;  %v3141_v27 = vrot.slane %v3133_v20, %v6146_v42  ;;  %v3148_v28 = vrot.slane %v3134_v21, %v6146_v42 }
 0xf0a   : > { %v3591_v35 = vrot.slane %v3583_v31, %v6146_v42  ;;  %v3651_v37 = vcombine.low %v3627_v32, %v3643_v33  ;;  %v3652_v39 = vcombine.high %v3627_v32, %v3643_v33  ;;  %v3598_v43 = vrot.slane %v3584_v26, %v6146_v42 }
 0xf0b   : > { %v3667_v47 = vcombine.low %v3634_v45, %v3650_v41  ;;  %v3607_v48 = vrot.slane %v3599_v44, %v6146_v42  ;;  %v3668_v52 = vcombine.high %v3634_v45, %v3650_v41  ;;  %v3614_v53 = vrot.slane %v3600_v50, %v6146_v42 }
 0xf0c   : > { %3687 = vxpose.xlu0.c.b16.start.end [1/1] (short) (narrow) %v3591_v35, 16  ;;  %v3659_v22 = vrot.slane %v3651_v37, %v6146_v42  ;;  %v3666_v46 = vrot.slane %v3652_v39, %v6146_v42  ;;  %v3615_v56 = vcombine.high %v3591_v35, %v5974_v63  ;;  %v3616_v58 = vcombine.high %v3598_v43, %v5974_v63 }
 0xf0d   : > { %v3675_v51 = vrot.slane %v3667_v47, %v6146_v42  ;;  %v3682_v54 = vrot.slane %v3668_v52, %v6146_v42  ;;  %v3617_v60 = vcombine.high %v3607_v48, %v5974_v63  ;;  %v3618_v62 = vcombine.high %v3614_v53, %v5974_v63 }
 0xf0e   : > { %3703 = vxpose.xlu1.c.b16.start.end [1/1] (short) (narrow) %v3659_v22, 16  ;;  %v3683_v57 = vcombine.high %v3659_v22, %v5974_v63  ;;  %v3684_v59 = vcombine.high %v3666_v46, %v5974_v63  ;;  %v3167_v29 = vcombine.high %v3157_v19, %v5968_v8  ;;  %v3165_v32 = vcombine.high %v3141_v27, %v5968_v8 }
 0xf0f   : > { %v3685_v61 = vcombine.high %v3675_v51, %v5974_v63  ;;  %v3686_v0 = vcombine.high %v3682_v54, %v5974_v63  ;;  %v3166_v33 = vcombine.high %v3148_v28, %v5968_v8  ;;  %v5640_v44 = vpack.c.bf16 %v3164_v18, %v3148_v28 }
 0xf10   : > { %3751 = vxpose.xlu0.c.b16.start.end [1/1] (short) (narrow) %v3598_v43, 16  ;;  %v5641_v26 = vpack.c.bf16 %v3167_v29, %v3165_v32  ;;  %v5639_v43 = vpack.c.bf16 %v3157_v19, %v3141_v27 }
 0xf12   : > { %3767 = vxpose.xlu1.c.b16.start.end [1/1] (short) (narrow) %v3666_v46, 16 }
 0xf14   : > { %3815 = vxpose.xlu0.c.b16.start.end [1/1] (short) (narrow) %v3607_v48, 16 }
 0xf16   : > { %3831 = vxpose.xlu1.c.b16.start.end [1/1] (short) (narrow) %v3675_v51, 16  ;;  %v3368_v51 = vrot.slane %v5641_v26, %v6140_v36 }
 0xf18   : > { %3879 = vxpose.xlu0.c.b16.start.end [1/1] (short) (narrow) %v3614_v53, 16 }
 0xf1a   : > { %3895 = vxpose.xlu1.c.b16.start.end [1/1] (short) (narrow) %v3682_v54, 16 }
 0xf1c   : > { %3719 = vxpose.xlu0.c.b16.start.end [1/1] (short) (narrow) %v3615_v56, 16 }
 0xf1e   : > { %3735 = vxpose.xlu1.c.b16.start.end [1/1] (short) (narrow) %v3683_v57, 16 }
 0xf20   : > { %3783 = vxpose.xlu0.c.b16.start.end [1/1] (short) (narrow) %v3616_v58, 16 }
 0xf22   : > { %3799 = vxpose.xlu1.c.b16.start.end [1/1] (short) (narrow) %v3684_v59, 16 }
 0xf24   : > { %3847 = vxpose.xlu0.c.b16.start.end [1/1] (short) (narrow) %v3617_v60, 16  ;;  %v3344_v60 = vrot.slane %v5639_v43, %v6140_v36 }
 0xf26   : > { %3863 = vxpose.xlu1.c.b16.start.end [1/1] (short) (narrow) %v3685_v61, 16  ;;  %v3352_v61 = vrot.slane %v5640_v44, %v6140_v36 }
 0xf28   : > { %3911 = vxpose.xlu0.c.b16.start.end [1/1] (short) (narrow) %v3618_v62, 16 }
 0xf2a   : > { %3927 = vxpose.xlu1.c.b16.start.end [1/1] (short) (narrow) %v3686_v0, 16 }
 0xf2e   : > { %3259 = vrot.lane.b32.xlu1 %v6418_v25, %s5975_s29 }
 0xf31   : > { %3257 = vrot.lane.b32.xlu0 %v6412_v23, %s5975_s29  ;;  %v3168_v23 = vcombine.high %v3164_v18, %v5968_v8 }
 0xf33   : > { %v5642_v38 = vpack.c.bf16 %v3168_v23, %v3166_v33 }
 0xf35   : > { %v3376_v52 = vrot.slane %v5642_v38, %v6140_v36 }
 0xf6e   : > { %v3695_v1 = vpop.trf.xlu0 }
 0xf70   : > { %v3711_v2 = vpop.trf.xlu1 }
 0xf72   : > { %v3759_v3 = vpop.trf.xlu0 }
 0xf73   : > { %v3943_v35 = vcombine.low %v3695_v1, %v3759_v3  ;;  %v3377_v3 = vcombine.low %v3368_v51, %v3376_v52 }
 0xf74   : > { %v3775_v5 = vpop.trf.xlu1 }
 0xf75   : > { %v3992_v22 = vcombine.low %v3711_v2, %v3775_v5  ;;  %v3950_v46 = vrot.slane %v3943_v35, %v6140_v36  ;;  %v3384_v12 = vrot.slane %v3377_v3, %v6146_v42 }
 0xf76   : > { %v3823_v7 = vpop.trf.xlu0 }
 0xf77   : > { %v3999_v53 = vrot.slane %v3992_v22, %v6140_v36  ;;  %v3389_v20 = vshrl.u32 %v3384_v12, 16  ;;  %v5959_v22 = vld [vmem:[%s6240_s24] ss:$0 sm:$0xff] }
 0xf78   : > { %v3839_v10 = vpop.trf.xlu1 }
 0xf7a   : > { %v3887_v49 = vpop.trf.xlu0 }
 0xf7b   : > { %v3959_v40 = vcombine.low %v3823_v7, %v3887_v49  ;;  %v3353_v7 = vcombine.low %v3344_v60, %v3352_v61 }
 0xf7c   : > { %v3903_v55 = vpop.trf.xlu1 }
 0xf7d   : > { %v4008_v47 = vcombine.low %v3839_v10, %v3903_v55  ;;  %v3966_v56 = vrot.slane %v3959_v40, %v6140_v36  ;;  %v3360_v13 = vrot.slane %v3353_v7, %v6146_v42 }
 0xf7e   : > { %v3727_v17 = vpop.trf.xlu0 }
 0xf7f   : > { %v4015_v62 = vrot.slane %v4008_v47, %v6140_v36  ;;  %v3388_v19 = vshrl.u32 %v3360_v13, 16 }
 0xf80   : > { %v3743_v24 = vpop.trf.xlu1 }
 0xf81   : > { %v3390_v18 = vpack.i.b16 %v3389_v20, %v3388_v19 }
 0xf82   : > { %v3791_v25 = vpop.trf.xlu0 }
 0xf83   : > { %v3951_v31 = vcombine.low %v3727_v17, %v3791_v25  ;;  %v3387_v17 = vpack.i.b16 %v3384_v12, %v3360_v13 }
 0xf84   : > { %v3807_v30 = vpop.trf.xlu1 }
 0xf85   : > { %v4000_v37 = vcombine.low %v3743_v24, %v3807_v30  ;;  %v3958_v41 = vrot.slane %v3951_v31, %v6140_v36 }
 0xf86   : > { %v3855_v34 = vpop.trf.xlu0 }
 0xf87   : > { %v4007_v48 = vrot.slane %v4000_v37, %v6140_v36  ;;  %v3975_v57 = vcombine.low %v3950_v46, %v3958_v41 }
 0xf88   : > { %v3871_v39 = vpop.trf.xlu1 }
 0xf89   : > { %v4024_v0 = vcombine.low %v3999_v53, %v4007_v48  ;;  %v3982_v4 = vrot.slane %v3975_v57, %v6146_v42 }
 0xf8a   : > { %v3919_v45 = vpop.trf.xlu0 }
 0xf8b   : > { %v3967_v50 = vcombine.low %v3855_v34, %v3919_v45  ;;  %v4031_v9 = vrot.slane %v4024_v0, %v6146_v42 }
 0xf8c   : > { %v3935_v54 = vpop.trf.xlu1 }
 0xf8d   : > { %v3974_v58 = vrot.slane %v3967_v50, %v6140_v36  ;;  %v4016_v59 = vcombine.low %v3871_v39, %v3935_v54 }
 0xf8f   : > { %v3983_v1 = vcombine.low %v3966_v56, %v3974_v58  ;;  %v4023_v2 = vrot.slane %v4016_v59, %v6140_v36 }
 0xf91   : > { %v3990_v5 = vrot.slane %v3983_v1, %v6146_v42  ;;  %v4032_v6 = vcombine.low %v4015_v62, %v4023_v2 }
 0xf93   : > { %v3991_v10 = vcombine.low %v3982_v4, %v3990_v5  ;;  %v4039_v11 = vrot.slane %v4032_v6, %v6146_v42 }
 0xf95   : > { %v4040_v49 = vcombine.low %v4031_v9, %v4039_v11  ;;  %v4045_v15 = vshrl.u32 %v3991_v10, 16 }
 0xf97   : > { %v4043_v14 = vpack.i.b16 %v4040_v49, %v3991_v10  ;;  %v4046_v55 = vshrl.u32 %v4040_v49, 16 }
 0xf99   : > { %5819 = vmatpush3.bf16.msra.mxu1 %v4043_v14  ;;  %v4047_v21 = vpack.i.b16 %v4046_v55, %v4045_v15 }
 0xf9a   : > { %5830 = vmatprep.subr.bf16.mxu1 %v5968_v8 }
 0xf9b   : > { %5825 = vmatpush3.bf16.msra.mxu0 %v4047_v21 }
 0xf9c   : > { %5821 = vmatmul.mubr.msk.bf16.vlgmr.msra.gmra.mxu1 %vm1696_vm2, %v3387_v17  ;;  %5836 = vmatprep.subr.bf16.mxu0 %v5968_v8 }
 0xf9d   : > { %5832 = vmatprep.mubr.msk.bf16.mxu1 %vm5969_vm1, %v5968_v8 }
 0xf9e   : > { %5827 = vmatmul.mubr.msk.bf16.vlgmr.msra.gmra.mxu0 %vm1696_vm2, %v3390_v18 }
 0xf9f   : > { %5838 = vmatprep.mubr.msk.bf16.mxu0 %vm5969_vm1, %v5968_v8 }
 0xfa0   : > { %v3260_v24 = vpop.permute.xlu1 %3259 }
 0xfa1   : > { %v3285_v28 = vrot.slane %v3260_v24, %v6140_v36  ;;  %v3278_v53 = vcombine.high %v3260_v24, %v5968_v8 }
 0xfa3   : > { %v3258_v27 = vpop.permute.xlu0 %3257  ;;  %v3292_v56 = vrot.slane %v3278_v53, %v6140_v36 }
 0xfa4   : > { %v3270_v25 = vrot.slane %v3258_v27, %v6140_v36  ;;  %v3263_v52 = vcombine.high %v3258_v27, %v5968_v8 }
 0xfa6   : > { %v3293_v29 = vcombine.low %v3270_v25, %v3285_v28  ;;  %v3294_v23 = vcombine.high %v3270_v25, %v3285_v28  ;;  %v3277_v54 = vrot.slane %v3263_v52, %v6140_v36 }
 0xfa8   : > { %v3301_v30 = vrot.slane %v3293_v29, %v6146_v42  ;;  %v3308_v31 = vrot.slane %v3294_v23, %v6146_v42  ;;  %v3309_v57 = vcombine.low %v3277_v54, %v3292_v56  ;;  %v3310_v59 = vcombine.high %v3277_v54, %v3292_v56 }
 0xfaa   : > { %v3329_v32 = vpack.c.bf16 %v3301_v30, %v3301_v30  ;;  %v3325_v33 = vcombine.high %v3301_v30, %v5968_v8  ;;  %v3326_v34 = vcombine.high %v3308_v31, %v5968_v8  ;;  %v3331_v26 = vpack.c.bf16 %v3308_v31, %v3308_v31 }
 0xfab   : > { %v3317_v58 = vrot.slane %v3309_v57, %v6146_v42  ;;  %v3324_v61 = vrot.slane %v3310_v59, %v6146_v42 }
 0xfac   : > { %4159 = vxpose.xlu1.c.b16.start.end [1/1] (short) (narrow) %v3329_v32, 16  ;;  %v3330_v35 = vpack.c.bf16 %v3325_v33, %v3325_v33  ;;  %v3332_v37 = vpack.c.bf16 %v3326_v34, %v3326_v34 }
 0xfad   : > { %v3327_v60 = vcombine.high %v3317_v58, %v5968_v8  ;;  %v3333_v62 = vpack.c.bf16 %v3317_v58, %v3317_v58  ;;  %v3328_v1 = vcombine.high %v3324_v61, %v5968_v8  ;;  %v3335_v2 = vpack.c.bf16 %v3324_v61, %v3324_v61 }
 0xfae   : > { %4175 = vxpose.xlu0.c.b16.start.end [1/1] (short) (narrow) %v3330_v35, 16 }
 0xfaf   : > { %v3334_v0 = vpack.c.bf16 %v3327_v60, %v3327_v60  ;;  %v3336_v3 = vpack.c.bf16 %v3328_v1, %v3328_v1 }
 0xfb0   : > { %4207 = vxpose.xlu1.c.b16.start.end [1/1] (short) (narrow) %v3332_v37, 16 }
 0xfb2   : > { %4191 = vxpose.xlu0.c.b16.start.end [1/1] (short) (narrow) %v3331_v26, 16 }
0x100e   : > { %v4167_v5 = vpop.trf.xlu1 }
0x100f   : > { %v4291_v55 = vshrl.u32 %v4167_v5, 16 }
0x1010   : > { %v4183_v4 = vpop.trf.xlu0 }
0x1011   : > { %v4292_v15 = vshrl.u32 %v4183_v4, 16  ;;  %v4289_v21 = vpack.i.b16 %v4183_v4, %v4167_v5 }
0x1012   : > { %v4215_v7 = vpop.trf.xlu1 }
0x1013   : > { %v4300_v19 = vshrl.u32 %v4215_v7, 16  ;;  %v4293_v23 = vpack.i.b16 %v4292_v15, %v4291_v55 }
0x1014   : > { %v4199_v6 = vpop.trf.xlu0 }
0x1015   : > { %v4299_v17 = vshrl.u32 %v4199_v6, 16  ;;  %v4297_v28 = vpack.i.b16 %v4215_v7, %v4199_v6 }
0x1017   : > { %v4301_v32 = vpack.i.b16 %v4300_v19, %v4299_v17 }
0x105c   : > { %v4086_v38 = vpop.f32.mrf.mxu1 }
0x105d   : > { %v6515_v39 = vadd.f32 %v5959_v22, %v4086_v38 }
0x105e   : > { %v5822_v40 = vpop.f32.mrf.mxu1  ;;  %v4129_v41 = vpop.f32.mrf.mxu0 }
0x105f   : > { %v6517_v43 = vadd.f32 %v5959_v22, %v4129_v41  ;;  %v4135_v44 = vsel %vm1783_vm3, %v6515_v39, -inf }
0x1060   : > { %4136 = vmax.xlane.f32.xlu0 %v4135_v44  ;;  %v4089_v45 = vpop.f32.mrf.mxu1  ;;  %v5828_v46 = vpop.f32.mrf.mxu0 }
0x1061   : > { %v4138_v47 = vsel %vm1783_vm3, %v6517_v43, -inf }
0x1062   : > { %v5823_v48 = vpop.f32.mrf.mxu1  ;;  %4139 = vmax.xlane.f32.xlu1 %v4138_v47  ;;  %v4132_v50 = vpop.f32.mrf.mxu0 }
0x1064   : > { %v5829_v51 = vpop.f32.mrf.mxu0 }
0x108d   : > { %4223 = vxpose.xlu0.c.b16.start.end [1/1] (short) (narrow) %v3333_v62, 16 }
0x108f   : > { %4239 = vxpose.xlu1.c.b16.start.end [1/1] (short) (narrow) %v3334_v0, 16 }
0x1091   : > { %4255 = vxpose.xlu0.c.b16.start.end [1/1] (short) (narrow) %v3335_v2, 16 }
0x1093   : > { %4271 = vxpose.xlu1.c.b16.start.end [1/1] (short) (narrow) %v3336_v3, 16 }
0x10e9   : > { %v4137_v9 = vpop.xlane.xlu0 %4136 }
0x10ea   : > { %v4141_v58 = vsub.f32 %v6515_v39, %v4137_v9 }
0x10eb   : > { %v4140_v10 = vpop.xlane.xlu1 %4139 }
0x10ec   : > { %v4142_v1 = vsub.f32 %v6517_v43, %v4140_v10  ;;  %v4143_v3 = vmul.f32 1.442695, %v4141_v58 }
0x10ee   : > { %v4145_v6 = vmul.f32 1.442695, %v4142_v1  ;;  %5943 = vpow2.f32 %v4143_v3 }
0x10ef   : > { %v4231_v11 = vpop.trf.xlu0 }
0x10f0   : > { %v4307_v12 = vshrl.u32 %v4231_v11, 16  ;;  %5945 = vpow2.f32 %v4145_v6 }
0x10f1   : > { %v4247_v49 = vpop.trf.xlu1 }
0x10f2   : > { %v4305_v13 = vpack.i.b16 %v4247_v49, %v4231_v11  ;;  %v4308_v14 = vshrl.u32 %v4247_v49, 16 }
0x10f3   : > { %v4263_v20 = vpop.trf.xlu0 }
0x10f4   : > { %v4309_v18 = vpack.i.b16 %v4308_v14, %v4307_v12  ;;  %v4315_v24 = vshrl.u32 %v4263_v20, 16  ;;  %v4319_v25 = vcombine.low %v4289_v21, %v4305_v13  ;;  %v4320_v50 = vcombine.high %v4289_v21, %v4305_v13 }
0x10f5   : > { %v4279_v27 = vpop.trf.xlu1 }
0x10f6   : > { %v4313_v29 = vpack.i.b16 %v4279_v27, %v4263_v20  ;;  %v4316_v30 = vshrl.u32 %v4279_v27, 16  ;;  %v4387_v33 = vcombine.low %v4293_v23, %v4309_v18  ;;  %v4327_v35 = vrot.slane %v4319_v25, %v6140_v36 }
0x10f7   : > { %v4388_v57 = vcombine.high %v4293_v23, %v4309_v18  ;;  %v4334_v59 = vrot.slane %v4320_v50, %v6140_v36 }
0x10f8   : > { %v4335_v31 = vcombine.low %v4297_v28, %v4313_v29  ;;  %v4317_v34 = vpack.i.b16 %v4316_v30, %v4315_v24  ;;  %v4395_v22 = vrot.slane %v4387_v33, %v6140_v36  ;;  %v4336_v46 = vcombine.high %v4297_v28, %v4313_v29 }
0x10f9   : > { %v4402_v2 = vrot.slane %v4388_v57, %v6140_v36 }
0x10fa   : > { %v4343_v37 = vrot.slane %v4335_v31, %v6140_v36  ;;  %v4403_v26 = vcombine.low %v4301_v32, %v4317_v34  ;;  %v4404_v51 = vcombine.high %v4301_v32, %v4317_v34  ;;  %v4350_v54 = vrot.slane %v4336_v46, %v6140_v36 }
0x10fb   : > { %v5944_v10 = vpop.eup %5943 }
0x10fc   : > { %v4351_v38 = vcombine.low %v4327_v35, %v4343_v37  ;;  %v4411_v40 = vrot.slane %v4403_v26, %v6140_v36  ;;  %v4352_v48 = vcombine.high %v4327_v35, %v4343_v37  ;;  %v4418_v60 = vrot.slane %v4404_v51, %v6140_v36 }
0x10fd   : > { %v4367_v0 = vcombine.low %v4334_v59, %v4350_v54  ;;  %v5946_v11 = vpop.eup %5945  ;;  %v4147_v12 = vsel %vm1783_vm3, %v5944_v10, 0.0  ;;  %v4368_v13 = vcombine.high %v4334_v59, %v4350_v54 }
0x10fe   : > { %v4359_v41 = vrot.slane %v4351_v38, %v6146_v42  ;;  %v4419_v44 = vcombine.low %v4395_v22, %v4411_v40  ;;  %v4420_v53 = vcombine.high %v4395_v22, %v4411_v40  ;;  %v4366_v56 = vrot.slane %v4352_v48, %v6146_v42 }
0x10ff   : > { %v4435_v39 = vcombine.low %v4402_v2, %v4418_v60  ;;  %v4375_v5 = vrot.slane %v4367_v0, %v6146_v42  ;;  %v4150_v49 = vsel %vm1783_vm3, %v5946_v11, 0.0  ;;  %v4436_v14 = vcombine.high %v4402_v2, %v4418_v60 }
0x1100   : > { %4455 = vxpose.xlu0.c.b16.start.end [1/1] (short) (narrow) %v4359_v41, 16  ;;  %v4427_v45 = vrot.slane %v4419_v44, %v6146_v42  ;;  %v4383_v47 = vcombine.high %v4359_v41, %v5974_v63  ;;  %v4434_v61 = vrot.slane %v4420_v53, %v6146_v42  ;;  %v4384_v62 = vcombine.high %v4366_v56, %v5974_v63 }
0x1101   : > { %v4443_v7 = vrot.slane %v4435_v39, %v6146_v42  ;;  %v4385_v9 = vcombine.high %v4375_v5, %v5974_v63  ;;  %v4382_v15 = vrot.slane %v4368_v13, %v6146_v42  ;;  %v4450_v55 = vrot.slane %v4436_v14, %v6146_v42 }
0x1102   : > { %4471 = vxpose.xlu1.c.b16.start.end [1/1] (short) (narrow) %v4427_v45, 16  ;;  %v4451_v52 = vcombine.high %v4427_v45, %v5974_v63  ;;  %v4452_v4 = vcombine.high %v4434_v61, %v5974_v63 }
0x1103   : > { %v4453_v43 = vcombine.high %v4443_v7, %v5974_v63  ;;  %v4386_v20 = vcombine.high %v4382_v15, %v5974_v63  ;;  %v4454_v21 = vcombine.high %v4450_v55, %v5974_v63 }
0x1104   : > { %4487 = vxpose.xlu0.c.b16.start.end [1/1] (short) (narrow) %v4383_v47, 16 }
0x1106   : > { %4503 = vxpose.xlu1.c.b16.start.end [1/1] (short) (narrow) %v4451_v52, 16 }
0x1108   : > { %4519 = vxpose.xlu0.c.b16.start.end [1/1] (short) (narrow) %v4366_v56, 16 }
0x110a   : > { %4535 = vxpose.xlu1.c.b16.start.end [1/1] (short) (narrow) %v4434_v61, 16 }
0x110c   : > { %4551 = vxpose.xlu0.c.b16.start.end [1/1] (short) (narrow) %v4384_v62, 16 }
0x110e   : > { %4567 = vxpose.xlu1.c.b16.start.end [1/1] (short) (narrow) %v4452_v4, 16 }
0x1110   : > { %4583 = vxpose.xlu0.c.b16.start.end [1/1] (short) (narrow) %v4375_v5, 16 }
0x1112   : > { %4599 = vxpose.xlu1.c.b16.start.end [1/1] (short) (narrow) %v4443_v7, 16 }
0x1114   : > { %4615 = vxpose.xlu0.c.b16.start.end [1/1] (short) (narrow) %v4385_v9, 16 }
0x1116   : > { %4631 = vxpose.xlu1.c.b16.start.end [1/1] (short) (narrow) %v4453_v43, 16 }
0x1121   : > { %4148 = vadd.xlane.f32.xlu0 %v4147_v12 }
0x1123   : > { %4151 = vadd.xlane.f32.xlu1 %v4150_v49 }
0x114e   : > { %4647 = vxpose.xlu0.c.b16.start.end [1/1] (short) (narrow) %v4382_v15, 16 }
0x1150   : > { %4663 = vxpose.xlu1.c.b16.start.end [1/1] (short) (narrow) %v4450_v55, 16 }
0x1152   : > { %4679 = vxpose.xlu0.c.b16.start.end [1/1] (short) (narrow) %v4386_v20, 16 }
0x1154   : > { %4695 = vxpose.xlu1.c.b16.start.end [1/1] (short) (narrow) %v4454_v21, 16 }
0x1162   : > { %v4463_v17 = vpop.trf.xlu0 }
0x1164   : > { %v4479_v19 = vpop.trf.xlu1 }
0x1166   : > { %v4495_v18 = vpop.trf.xlu0 }
0x1168   : > { %v4511_v24 = vpop.trf.xlu1 }
0x116a   : > { %v4527_v27 = vpop.trf.xlu0 }
0x116b   : > { %v4711_v37 = vcombine.low %v4463_v17, %v4527_v27  ;;  %v5915_v27 = vld [vmem:[%s6702_s6 + $0x18] sm:$0xff]  }
0x116c   : > { %v4543_v28 = vpop.trf.xlu1 }
0x116d   : > { %v4760_v63 = vcombine.low %v4479_v19, %v4543_v28  ;;  %v4718_v44 = vrot.slane %v4711_v37, %v6140_v36 }
0x116e   : > { %v4559_v25 = vpop.trf.xlu0 }
0x116f   : > { %v4719_v38 = vcombine.low %v4495_v18, %v4559_v25  ;;  %v4767_v46 = vrot.slane %v4760_v63, %v6140_v36 }
0x1170   : > { %v4575_v29 = vpop.trf.xlu1 }
0x1171   : > { %v4768_v26 = vcombine.low %v4511_v24, %v4575_v29  ;;  %v4726_v48 = vrot.slane %v4719_v38, %v6140_v36 }
0x1172   : > { %v4591_v23 = vpop.trf.xlu0 }
0x1173   : > { %v4775_v47 = vrot.slane %v4768_v26, %v6140_v36  ;;  %v4743_v60 = vcombine.low %v4718_v44, %v4726_v48 }
0x1174   : > { %v4607_v30 = vpop.trf.xlu1 }
0x1175   : > { %v4792_v59 = vcombine.low %v4767_v46, %v4775_v47  ;;  %v4750_v6 = vrot.slane %v4743_v60, %v6146_v42 }
0x1176   : > { %v4623_v31 = vpop.trf.xlu0 }
0x1177   : > { %v4799_v5 = vrot.slane %v4792_v59, %v6146_v42 }
0x1178   : > { %v4639_v32 = vpop.trf.xlu1 }
0x11aa   : > { %v4149_v33 = vpop.xlane.xlu0 %4148 }
0x11ab   : > { %5947 = vrcp.f32 %v4149_v33 }
0x11ac   : > { %v4152_v34 = vpop.xlane.xlu1 %4151 }
0x11ad   : > { %5949 = vrcp.f32 %v4152_v34 }
0x11b0   : > { %v4655_v35 = vpop.trf.xlu0 }
0x11b1   : > { %v4727_v22 = vcombine.low %v4591_v23, %v4655_v35 }
0x11b2   : > { %v4671_v40 = vpop.trf.xlu1 }
0x11b3   : > { %v4776_v50 = vcombine.low %v4607_v30, %v4671_v40  ;;  %v4734_v51 = vrot.slane %v4727_v22, %v6140_v36  ;;  %v5916_v22 = vld [vmem:[%s6702_s6 + $0x10] sm:$0xff]  }
0x11b4   : > { %v4687_v41 = vpop.trf.xlu0 }
0x11b5   : > { %v4735_v45 = vcombine.low %v4623_v31, %v4687_v41  ;;  %v4783_v61 = vrot.slane %v4776_v50, %v6140_v36 }
0x11b6   : > { %v4703_v53 = vpop.trf.xlu1 }
0x11b7   : > { %v4742_v52 = vrot.slane %v4735_v45, %v6140_v36  ;;  %v4784_v56 = vcombine.low %v4639_v32, %v4703_v53 }
0x11b8   : > { %v5948_v54 = vpop.eup %5947 }
0x11b9   : > { %v4751_v57 = vcombine.low %v4734_v51, %v4742_v52  ;;  %v4155_v58 = vmul.f32 %v5948_v54, %v5944_v10  ;;  %v4791_v62 = vrot.slane %v4784_v56, %v6140_v36 }
0x11ba   : > { %v5950_v0 = vpop.eup %5949 }
0x11bb   : > { %v4157_v1 = vpack.c.bf16 %v4155_v58, %v4155_v58  ;;  %v4758_v2 = vrot.slane %v4751_v57, %v6146_v42  ;;  %v4800_v3 = vcombine.low %v4783_v61, %v4791_v62  ;;  %v4156_v4 = vmul.f32 %v5950_v0, %v5946_v11 }
0x11bd   : > { %v4819_v39 = vsel %vm1783_vm3, %v4157_v1, 0  ;;  %v4807_v7 = vrot.slane %v4800_v3, %v6146_v42  ;;  %v4158_v9 = vpack.c.bf16 %v4156_v4, %v4156_v4  ;;  %v4759_v43 = vcombine.low %v4750_v6, %v4758_v2 }
0x11be   : > { %5831 = vmatpush3.bf16.xpose.msra.mxu1 %v4819_v39 }
0x11bf   : > { %5842 = vmatprep.subr.bf16.mxu1 %v5968_v8  ;;  %v4808_v10 = vcombine.low %v4799_v5, %v4807_v7  ;;  %v4866_v12 = vsel %vm1783_vm3, %v4158_v9, 0  ;;  %v4812_v13 = vshrl.u32 %v4759_v43, 16 }
0x11c0   : > { %5837 = vmatpush3.bf16.xpose.msra.mxu0 %v4866_v12 }
0x11c1   : > { %v4813_v49 = vshrl.u32 %v4808_v10, 16  ;;  %5850 = vmatprep.subr.bf16.mxu0 %v5968_v8  ;;  %v4811_v11 = vpack.i.b16 %v4808_v10, %v4759_v43  ;;  %v5917_v10 = vld [vmem:[%s6706_s10 + $0x18] sm:$0xff]  }
0x11c3   : > { %v4814_v14 = vpack.i.b16 %v4813_v49, %v4812_v13 }
0x11c5   : > { %5833 = vmatmul.mubr.msk.bf16.vlgmr.msra.gmra.mxu1 %vm1783_vm3, %v4811_v11 }
0x11c6   : > { %5846 = vmatprep.mubr.msk.bf16.mxu1 %vm5969_vm1, %v5968_v8  ;;  %5843 = vmatpush3.bf16.msra.mxu1 %v5915_v27  ;;  %v5922_v27 = vld [vmem:[%s6708_s12 + $0x20] sm:$0xff]  }
0x11c7   : > { %5839 = vmatmul.mubr.msk.bf16.vlgmr.msra.gmra.mxu0 %vm1783_vm3, %v4814_v14  ;;  %5844 = vmatprep.subr.bf16.mxu1 %v5968_v8  ;;  %v5660_v14 = vld [vmem:[%s6704_s8 + $0x1] ss:$0 sm:$0xff] }
0x11c8   : > { %5854 = vmatprep.mubr.msk.bf16.mxu0 %vm5969_vm1, %v5968_v8  ;;  %5851 = vmatpush3.bf16.msra.mxu0 %v5917_v10 }
0x11c9   : > { %5852 = vmatprep.subr.bf16.mxu0 %v5968_v8 }
0x11ca   : > { %5845 = vmatpush3.bf16.msra.mxu1 %v5916_v22 }
0x11cb   : > { %5858 = vmatprep.subr.bf16.mxu1 %v5968_v8 }
0x1285   : > { %v4855_v15 = vpop.f32.mrf.mxu1 }
0x1286   : > { %4909 = vxpose.xlu0.b32.start [1/2] (short) (narrow) %v4855_v15, 8 }
0x1287   : > { %v5834_v55 = vpop.f32.mrf.mxu1  ;;  %v4902_v20 = vpop.f32.mrf.mxu0 }
0x1288   : > { %4941 = vxpose.xlu1.b32.start [1/2] (short) (narrow) %v4902_v20, 8  ;;  %v5661_v55 = vld [vmem:[%s6705_s9 + $0x1] ss:$0 sm:$0xff] }
0x1289   : > { %v4858_v21 = vpop.f32.mrf.mxu1  ;;  %v5840_v17 = vpop.f32.mrf.mxu0 }
0x128a   : > { %4910 = vxpose.xlu0.b32.end [2/2] (short) (narrow) %v4858_v21, 8 }
0x128b   : > { %v5835_v19 = vpop.f32.mrf.mxu1  ;;  %v4905_v18 = vpop.f32.mrf.mxu0 }
0x128c   : > { %4942 = vxpose.xlu1.b32.end [2/2] (short) (narrow) %v4905_v18, 8  ;;  %v5919_v19 = vld [vmem:[%s6708_s12 + $0x38] sm:$0xff]   ;;  %v5920_v18 = vld [vmem:[%s6708_s12 + $0x30] sm:$0xff]  }
0x128d   : > { %v5841_v24 = vpop.f32.mrf.mxu0 }
0x128e   : > { %v5921_v24 = vld [vmem:[%s6708_s12 + $0x28] sm:$0xff]  }
0x1302   : > { %v4925_v28 = vpop.trf.xlu0 }
0x1303   : > { %v4973_v25 = vcombine.high %v4925_v28, %v5968_v8  ;;  %v4980_v29 = vrot.slane %v4925_v28, %v6140_v36  ;;  %v5667_v28 = vld [vmem:[%s6707_s11 + $0x1] ss:$0 sm:$0xff] }
0x1304   : > { %v4957_v23 = vpop.trf.xlu1 }
0x1305   : > { %v4987_v30 = vrot.slane %v4973_v25, %v6140_v36  ;;  %v4988_v31 = vcombine.high %v4957_v23, %v5968_v8  ;;  %v4995_v32 = vrot.slane %v4957_v23, %v6140_v36 }
0x1307   : > { %v5002_v33 = vrot.slane %v4988_v31, %v6140_v36  ;;  %v5003_v34 = vcombine.low %v4980_v29, %v4995_v32  ;;  %v5004_v35 = vcombine.high %v4980_v29, %v4995_v32 }
0x1309   : > { %v5011_v37 = vrot.slane %v5003_v34, %v6146_v42  ;;  %v5018_v63 = vrot.slane %v5004_v35, %v6146_v42  ;;  %v5019_v26 = vcombine.low %v4987_v30, %v5002_v33  ;;  %v5020_v38 = vcombine.high %v4987_v30, %v5002_v33 }
0x130b   : > { %v5027_v40 = vrot.slane %v5019_v26, %v6146_v42  ;;  %v5034_v41 = vrot.slane %v5020_v38, %v6146_v42  ;;  %v5039_v44 = vcombine.low %v5011_v37, %v5018_v63  ;;  %v5647_v45 = vcombine.high %v5011_v37, %v5018_v63 }
0x130d   : > { %v5046_v46 = vrot.slane %v5039_v44, %v6140_v36  ;;  %v5054_v47 = vrot.slane %v5647_v45, %v6140_v36  ;;  %v5055_v48 = vcombine.low %v5027_v40, %v5034_v41  ;;  %v5648_v50 = vcombine.high %v5027_v40, %v5034_v41  ;;  %v5680_v41 = vld [vmem:[%s6709_s13 + $0x1] ss:$0 sm:$0xff] }
0x130f   : > { %v5062_v51 = vrot.slane %v5055_v48, %v6140_v36  ;;  %v5070_v52 = vrot.slane %v5648_v50, %v6140_v36  ;;  %v5071_v53 = vcombine.low %v5046_v46, %v5054_v47  ;;  %v5654_v36 = vld [vmem:[%s6703_s7 + $0x1] ss:$0 sm:$0xff] }
0x1311   : > { %v5079_v54 = vcombine.low %v5062_v51, %v5070_v52  ;;  %v5078_v56 = vrot.slane %v5071_v53, %v6146_v42 }
0x1313   : > { %v5086_v57 = vrot.slane %v5079_v54, %v6146_v42 }
0x1315   : > { %v5088_v58 = vcombine.high %v5078_v56, %v5086_v57  ;;  %v5087_v59 = vcombine.low %v5078_v56, %v5086_v57 }
0x1317   : > { %5090 = vrot.lane.b32.xlu0 %v5088_v58, %s6730_s2  ;;  %v5923_v58 = vld [vmem:[%s6712_s16 + $0x8] sm:$0xff]  }
0x1389   : > { %v5091_v60 = vpop.permute.xlu0 %5090 }
0x138a   : > { %v5093_v61 = vsel %vm1696_vm2, %v5087_v59, %v5091_v60  ;;  %v5924_v59 = vld [vmem:[%s6712_s16] sm:$0xff]  }
0x138b   : > { %v5094_v62 = vpack.c.bf16 %v5093_v61, %v5093_v61 }
0x138d   : > { %5847 = vmatmul.mubr.msk.bf16.vlgmr.msra.gmra.mxu1 %vm643_vm0, %v5094_v62 }
0x138e   : > { %5866 = vmatprep.mubr.msk.bf16.mxu1 %vm5969_vm1, %v5968_v8  ;;  %5859 = vmatpush3.bf16.msra.mxu1 %v5919_v19 }
0x138f   : > { %5860 = vmatprep.subr.bf16.mxu1 %v5968_v8 }
0x1392   : > { %5861 = vmatpush3.bf16.msra.mxu1 %v5920_v18 }
0x1393   : > { %5862 = vmatprep.subr.bf16.mxu1 %v5968_v8 }
0x1396   : > { %5863 = vmatpush3.bf16.msra.mxu1 %v5921_v24 }
0x1397   : > { %5864 = vmatprep.subr.bf16.mxu1 %v5968_v8 }
0x139a   : > { %5865 = vmatpush3.bf16.msra.mxu1 %v5922_v27 }
0x144d   : > { %v5157_v0 = vpop.f32.mrf.mxu1 }
0x144e   : > { %v5158_v1 = vadd.f32 %v5654_v36, %v5157_v0  ;;  %v5688_v0 = vld [vmem:[%s6710_s14 + $0x1] ss:$0 sm:$0xff] }
0x144f   : > { %v5848_v42 = vpop.f32.mrf.mxu1 }
0x1450   : > { %v5163_v2 = vadd.f32 %v5158_v1, %v6402_v16  ;;  %v5918_v16 = vld [vmem:[%s6706_s10 + $0x10] sm:$0xff]   ;;  %v5689_v42 = vld [vmem:[%s6711_s15 + $0x1] ss:$0 sm:$0xff] }
0x1451   : > { %v5160_v3 = vpop.f32.mrf.mxu1  ;;  %5853 = vmatpush3.bf16.msra.mxu0 %v5918_v16 }
0x1452   : > { %v5168_v4 = vsel %vm643_vm0, %v5163_v2, 0.0  ;;  %5870 = vmatprep.subr.bf16.mxu0 %v5968_v8 }
0x1453   : > { %5169 = vadd.xlane.f32.xlu1 %v5168_v4  ;;  %v5849_v39 = vpop.f32.mrf.mxu1 }
0x1454   : > { %v5925_v39 = vld [vmem:[%s6714_s18 + $0x8] sm:$0xff]  }
0x14dc   : > { %v5170_v5 = vpop.xlane.xlu1 %5169 }
0x14dd   : > { %v5171_v6 = vmul.f32 0.03125, %v5170_v5  ;;  %v5926_v5 = vld [vmem:[%s6714_s18] sm:$0xff]  }
0x14df   : > { %v5172_v7 = vsub.f32 %v5163_v2, %v5171_v6  ;;  %v5690_v6 = vld [vmem:[%s6713_s17] ss:$0 sm:$0xff] }
0x14e1   : > { %v5173_v9 = vmul.f32 %v5172_v7, %v5172_v7 }
0x14e3   : > { %v5174_v43 = vsel %vm643_vm0, %v5173_v9, 0.0 }
0x14e4   : > { %5175 = vadd.xlane.f32.xlu0 %v5174_v43 }
0x156d   : > { %v5176_v12 = vpop.xlane.xlu0 %5175 }
0x156e   : > { %v5177_v49 = vmul.f32 0.03125, %v5176_v12 }
0x1570   : > { %v5178_v11 = vadd.f32 1e-12, %v5177_v49 }
0x1572   : > { %5951 = vrsqrt.f32 %v5178_v11 }
0x157f   : > { %v5952_v13 = vpop.eup %5951 }
0x1580   : > { %v5180_v15 = vmul.f32 %v5952_v13, %v5172_v7 }
0x1582   : > { %v5187_v20 = vmul.f32 %v5660_v14, %v5180_v15 }
0x1584   : > { %v5194_v21 = vadd.f32 %v5661_v55, %v5187_v20 }
0x1586   : > { %v5195_v17 = vpack.c.bf16 %v5194_v21, %v5194_v21 }
0x1588   : > { %5855 = vmatmul.mubr.msk.bf16.vlgmr.msra.gmra.mxu0 %vm643_vm0, %v5195_v17 }
0x1589   : > { %5874 = vmatprep.mubr.msk.bf16.mxu0 %vm5969_vm1, %v5968_v8  ;;  %5871 = vmatpush3.bf16.msra.mxu0 %v5923_v58 }
0x158a   : > { %5872 = vmatprep.subr.bf16.mxu0 %v5968_v8 }
0x158d   : > { %5873 = vmatpush3.bf16.msra.mxu0 %v5924_v59 }
0x158e   : > { %5878 = vmatprep.subr.bf16.mxu0 %v5968_v8 }
0x1648   : > { %v5258_v25 = vpop.f32.mrf.mxu0 }
0x1649   : > { %v5259_v29 = vadd.f32 %v5667_v28, %v5258_v25 }
0x164a   : > { %v5856_v23 = vpop.f32.mrf.mxu0 }
0x164b   : > { %v5265_v30 = vmul.f32 0.044715, %v5259_v29  ;;  %v5264_v26 = vmul.f32 0.5, %v5259_v29 }
0x164c   : > { %v5261_v31 = vpop.f32.mrf.mxu0 }
0x164d   : > { %v5266_v32 = vmul.f32 %v5265_v30, %v5259_v29 }
0x164e   : > { %v5857_v33 = vpop.f32.mrf.mxu0 }
0x164f   : > { %v5267_v34 = vmul.f32 %v5266_v32, %v5259_v29 }
0x1651   : > { %v5268_v35 = vadd.f32 %v5267_v34, %v5259_v29 }
0x1653   : > { %v5269_v37 = vmul.f32 0.7978846, %v5268_v35 }
0x1655   : > { %5953 = vtanh.f32 %v5269_v37 }
0x1662   : > { %v5954_v63 = vpop.eup %5953 }
0x1663   : > { %v5271_v38 = vadd.f32 1.0, %v5954_v63 }
0x1665   : > { %v5272_v22 = vmul.f32 %v5271_v38, %v5264_v26 }
0x1667   : > { %v5273_v40 = vpack.c.bf16 %v5272_v22, %v5272_v22 }
0x1669   : > { %5867 = vmatmul.mubr.msk.bf16.vlgmr.msra.gmra.mxu1 %vm2956_vm4, %v5273_v40 }
0x1729   : > { %v5352_v44 = vpop.f32.mrf.mxu1 }
0x172a   : > { %v5353_v45 = vadd.f32 %v5680_v41, %v5352_v44 }
0x172b   : > { %v5868_v46 = vpop.f32.mrf.mxu1 }
0x172c   : > { %v5358_v47 = vadd.f32 %v5353_v45, %v5194_v21 }
0x172d   : > { %v5355_v48 = vpop.f32.mrf.mxu1 }
0x172e   : > { %v5363_v50 = vsel %vm643_vm0, %v5358_v47, 0.0 }
0x172f   : > { %5364 = vadd.xlane.f32.xlu1 %v5363_v50  ;;  %v5869_v51 = vpop.f32.mrf.mxu1 }
0x17b8   : > { %v5365_v52 = vpop.xlane.xlu1 %5364 }
0x17b9   : > { %v5366_v53 = vmul.f32 0.03125, %v5365_v52 }
0x17bb   : > { %v5367_v54 = vsub.f32 %v5358_v47, %v5366_v53 }
0x17bd   : > { %v5368_v56 = vmul.f32 %v5367_v54, %v5367_v54 }
0x17bf   : > { %v5369_v57 = vsel %vm643_vm0, %v5368_v56, 0.0 }
0x17c0   : > { %5370 = vadd.xlane.f32.xlu1 %v5369_v57 }
0x1849   : > { %v5371_v60 = vpop.xlane.xlu1 %5370 }
0x184a   : > { %v5372_v61 = vmul.f32 0.03125, %v5371_v60 }
0x184c   : > { %v5373_v62 = vadd.f32 1e-12, %v5372_v61 }
0x184e   : > { %5955 = vrsqrt.f32 %v5373_v62 }
0x185b   : > { %v5956_v36 = vpop.eup %5955 }
0x185c   : > { %v5375_v1 = vmul.f32 %v5956_v36, %v5367_v54 }
0x185e   : > { %v5382_v2 = vmul.f32 %v5688_v0, %v5375_v1 }
0x1860   : > { %v5389_v3 = vadd.f32 %v5689_v42, %v5382_v2 }
0x1862   : > { %v5390_v4 = vpack.c.bf16 %v5389_v3, %v5389_v3 }
0x1864   : > { %5875 = vmatmul.mubr.msk.bf16.vlgmr.msra.gmra.mxu0 %vm643_vm0, %v5390_v4 }
0x1865   : > { %5882 = vmatprep.mubr.msk.bf16.mxu0 %vm5969_vm1, %v5968_v8  ;;  %5879 = vmatpush3.bf16.msra.mxu0 %v5925_v39 }
0x1866   : > { %5880 = vmatprep.subr.bf16.mxu0 %v5968_v8  ;;  %v5694_v8 = vld [vmem:[%s6715_s19] ss:$0 sm:$0xff] }
0x1869   : > { %5881 = vmatpush3.bf16.msra.mxu0 %v5926_v5 }
0x1924   : > { %v5451_v7 = vpop.f32.mrf.mxu0 }
0x1925   : > { %v5452_v9 = vadd.f32 %v5690_v6, %v5451_v7 }
0x1926   : > { %v5876_v43 = vpop.f32.mrf.mxu0 }
0x1927   : > { %5957 = vtanh.f32 %v5452_v9 }
0x1928   : > { %v5454_v10 = vpop.f32.mrf.mxu0 }
0x192a   : > { %v5877_v16 = vpop.f32.mrf.mxu0 }
0x1934   : > { %v5958_v12 = vpop.eup %5957 }
0x1935   : > { %v5458_v49 = vpack.c.bf16 %v5958_v12, %v5958_v12 }
0x1937   : > { %5883 = vmatmul.mubr.msk.bf16.vlgmr.msra.gmra.mxu0 %vm643_vm0, %v5458_v49 }
0x19f7   : > { %v5519_v11 = vpop.f32.mrf.mxu0 }
0x19f8   : > { %v5520_v13 = vadd.f32 %v5694_v8, %v5519_v11 }
0x19f9   : > { %v5884_v14 = vpop.f32.mrf.mxu0 }
0x19fa   : > { %5525 = vst [vmem:[%s638_s0] sm:$0xff] %v5520_v13 }
0x19fb   : > { %v5522_v15 = vpop.f32.mrf.mxu0 }
0x19fd   : > { %v5885_v55 = vpop.f32.mrf.mxu0 }
0x19fe PF: > { %s30_s1 = sadd.s32 1, %s5966_s1  }
0x19ff   : > { %p27_p4 = scmp.ge.s32.totalorder %s30_s1, 4  }
0x1a01   :  { %29 = sbr.rel (!%p27_p4) target bundleno = 6 (0x6), region = 145 }

</bundles_post_ra>
